<compile_context>
chip_gen: v6e
topology: v6e:2x2x1
jax: 0.10.0
libtpu: 0.0.40
codegen_flags: <defaults>
</compile_context>

<pallas_src>
import math
import functools

import jax
import jax.numpy as jnp
from jax.experimental import pallas as pl
from jax.experimental.pallas import tpu as pltpu


def _layernorm(v, w, b, eps=1e-5):
    mu = jnp.mean(v, axis=-1, keepdims=True)
    var = jnp.mean((v - mu) ** 2, axis=-1, keepdims=True)
    return (v - mu) * jax.lax.rsqrt(var + eps) * w + b


# --------------------------------------------------------------------------
# Fused kernel: one batch tile x one encoder layer per grid step.
# grid = (num_batch_tiles, num_layers); layer axis is innermost/"arbitrary".
# --------------------------------------------------------------------------
def encoder_stack_kernel(x_ref, bias_ref,
                         wqkv_ref, bqkv_ref, wo_ref, bo_ref,
                         ln1w_ref, ln1b_ref,
                         w1_ref, b1_ref, w2_ref, b2_ref,
                         ln2w_ref, ln2b_ref,
                         out_ref, act_ref, ao_ref,
                         *, nhead, head_dim, compute_dtype, approx_recip):
    l = pl.program_id(1)

    # Load input activation once per batch tile (layer 0); afterwards the
    # activation lives in the VMEM scratch across all layer iterations.
    @pl.when(l == 0)
    def _():
        act_ref[...] = x_ref[...].astype(jnp.float32)

    NB, S, D = act_ref.shape
    R = NB * S

    x3 = act_ref[...]                                   # (NB, S, D) f32
    x2 = x3.reshape(R, D).astype(compute_dtype)         # flatten rows for MXU

    # ---- fused QKV projection: one matmul, f32 accumulation, then a SINGLE
    #      cast to compute_dtype (no per-head-slice casts, smaller temporary).
    qkv = (jnp.dot(x2, wqkv_ref[...], preferred_element_type=jnp.float32)
           + bqkv_ref[...]).astype(compute_dtype)       # (R, 3D)

    bias = bias_ref[...]                                # (NB, 1, S) key-pad bias

    # ---- multi-head attention (batched over the batch tile) ----
    # Per-head outputs are staged head-major into ao_ref (compute dtype) so
    # the output projection is ONE (R,D)x(D,D) matmul (full K=D MXU fill)
    # instead of nhead K=head_dim dots.
    for h in range(nhead):                              # static head loop
        lo = h * head_dim
        hi = lo + head_dim
        q_h = qkv[:, lo:hi].reshape(NB, S, head_dim)
        k_h = qkv[:, D + lo:D + hi].reshape(NB, S, head_dim)
        v_h = qkv[:, 2 * D + lo:2 * D + hi].reshape(NB, S, head_dim)

        # scale 1/sqrt(head_dim) already folded into wq/bq at build time
        s = jnp.einsum('bqd,bkd->bqk', q_h, k_h,
                       preferred_element_type=jnp.float32) + bias   # (NB,S,S)
        s = s - jnp.max(s, axis=-1, keepdims=True)
        p = jnp.exp(s)
        p = p * pl.reciprocal(jnp.sum(p, axis=-1, keepdims=True),
                              approx=approx_recip)
        o_h = jnp.einsum('bqk,bkd->bqd', p.astype(compute_dtype), v_h,
                         preferred_element_type=jnp.float32)        # (NB,S,hd)
        ao_ref[:, :, lo:hi] = o_h.astype(compute_dtype)             # masked vst

    attn2 = jnp.dot(ao_ref[...].reshape(R, D), wo_ref[...],
                    preferred_element_type=jnp.float32)             # (R, D)
    attn = attn2.reshape(NB, S, D) + bo_ref[...]

    # ---- residual + LayerNorm 1 (f32) ----
    y = _layernorm(x3 + attn, ln1w_ref[...], ln1b_ref[...])

    # ---- feed-forward (ReLU), rows flattened for MXU ----
    y2 = y.reshape(R, D).astype(compute_dtype)
    # fuse ReLU with the compute-dtype cast: the f32 (R,F) tensor is not kept live
    h1 = jnp.maximum(
        jnp.dot(y2, w1_ref[...], preferred_element_type=jnp.float32) + b1_ref[...],
        0.0).astype(compute_dtype)
    h2 = jnp.dot(h1, w2_ref[...],
                 preferred_element_type=jnp.float32) + b2_ref[...]

    # ---- residual + LayerNorm 2 (f32) ----
    z = _layernorm(y + h2.reshape(NB, S, D), ln2w_ref[...], ln2b_ref[...])

    act_ref[...] = z                                    # carry to next layer

    @pl.when(l == pl.num_programs(1) - 1)
    def _():
        out_ref[...] = z.astype(out_ref.dtype)


# --------------------------------------------------------------------------
# Wrapper helpers: param stacking, VMEM accounting, batch-tile selection.
# --------------------------------------------------------------------------
def _stack_layer_params(layer_params, nhead, compute_dtype):
    D = layer_params[0]["wq"].shape[0]
    head_dim = D // nhead
    scale = 1.0 / math.sqrt(head_dim)

    wqkv = jnp.stack([jnp.concatenate([p["wq"] * scale, p["wk"], p["wv"]], axis=1)
                      for p in layer_params]).astype(compute_dtype)       # (L, D, 3D)
    bqkv = jnp.stack([jnp.concatenate([p["bq"] * scale, p["bk"], p["bv"]], axis=1)
                      for p in layer_params]).astype(jnp.float32)         # (L, 1, 3D)

    def stk(name, dt):
        return jnp.stack([p[name] for p in layer_params]).astype(dt)

    return [
        wqkv, bqkv,
        stk("wo", compute_dtype), stk("bo", jnp.float32),
        stk("ln1w", jnp.float32), stk("ln1b", jnp.float32),
        stk("w1", compute_dtype), stk("b1", jnp.float32),
        stk("w2", compute_dtype), stk("b2", jnp.float32),
        stk("ln2w", jnp.float32), stk("ln2b", jnp.float32),
    ]


def _estimate_vmem_bytes(NB, S, D, F, compute_dtype, out_dtype):
    """Rough per-core VMEM footprint of one grid step (for tiling / limits)."""
    cb = jnp.dtype(compute_dtype).itemsize
    ob = jnp.dtype(out_dtype).itemsize
    R = NB * S
    scratch = NB * S * D * 4 + NB * S * D * cb                  # act + attn-out scratch
    blocks = 2 * NB * S * D * 4 + 2 * NB * S * 4 + 2 * NB * S * D * ob   # 2x-buffered x/bias/out
    w_mm = (D * 3 * D + D * D + D * F + F * D) * cb             # matmul weights (compute dtype)
    w_small = (3 * D + 6 * D + F) * 4                           # biases / LayerNorm params (f32)
    weights = 2 * (w_mm + w_small)                              # double-buffered layer stream
    temps = (R * 3 * D * (4 + cb)                               # qkv f32 + compute copy
             + 2 * NB * S * S * 4                               # one head's scores/probs
             + R * F * (4 + cb)                                 # FFN hidden f32 + compute copy
             + 4 * R * D * 4)                                   # attn / residual / LN temps
    return scratch + blocks + weights + temps


def _auto_batch_tile(B, S, D, F, compute_dtype, out_dtype, budget):
    divisors = sorted((d for d in range(1, B + 1) if B % d == 0), reverse=True)
    fits = [nb for nb in divisors
            if _estimate_vmem_bytes(nb, S, D, F, compute_dtype, out_dtype) <= budget]
    if not fits:
        return 1
    best = fits[0]
    if B // best < 2:
        # prefer >= 2 batch tiles so the "parallel" axis can use both
        # TensorCores on v7x, as long as a smaller tile still fits
        for nb in fits:
            if B // nb >= 2:
                return nb
    return best


# --------------------------------------------------------------------------
# Full TransformerEncoder forward.
# --------------------------------------------------------------------------
def transformer_encoder_pallas(src, src_key_padding_mask, layer_params, *,
                               nhead, compute_dtype=jnp.bfloat16,
                               out_dtype=None, batch_tile=None):
    """src: (B,S,D) ; src_key_padding_mask: (B,S) bool, True = pad/ignore."""
    B, S0, D = src.shape
    L = len(layer_params)
    head_dim = D // nhead
    F = layer_params[0]["w1"].shape[1]
    out_dtype = src.dtype if out_dtype is None else out_dtype

    # Sublane-align the sequence (padded keys are masked, padded query rows
    # stripped after the call).  For large S use 128 here for lane density.
    seq_align = 8
    S = -(-S0 // seq_align) * seq_align
    if S != S0:
        src = jnp.pad(src, ((0, 0), (0, S - S0), (0, 0)))
        src_key_padding_mask = jnp.pad(src_key_padding_mask,
                                       ((0, 0), (0, S - S0)),
                                       constant_values=True)

    # VMEM budget: query the chip; fall back to the smallest (v7x, 64 MiB).
    try:
        vmem_cap = int(pltpu.get_tpu_info().vmem_capacity_bytes)
    except Exception:
        vmem_cap = 64 << 20

    if batch_tile is None:
        NB = _auto_batch_tile(B, S, D, F, compute_dtype, out_dtype,
                              budget=int(0.45 * vmem_cap))
    else:
        NB = batch_tile
    assert B % NB == 0, "batch_tile must divide batch size"

    footprint = _estimate_vmem_bytes(NB, S, D, F, compute_dtype, out_dtype)
    vmem_limit = int(min(max(int(footprint * 1.25), 32 << 20),
                         int(0.9 * vmem_cap)))

    params = _stack_layer_params(layer_params, nhead, compute_dtype)
    # key_padding_mask: True = ignore that key position (PyTorch convention)
    bias = jnp.where(src_key_padding_mask, -1e9, 0.0).astype(jnp.float32)[:, None, :]  # (B,1,S)
    x = src.astype(jnp.float32)

    in_specs = [
        pl.BlockSpec((NB, S, D), lambda bi, li: (bi, 0, 0)),   # activation batch tile
        pl.BlockSpec((NB, 1, S), lambda bi, li: (bi, 0, 0)),   # key-pad bias
    ]
    for p in params:                                           # layer-streamed params
        in_specs.append(
            pl.BlockSpec((None,) + tuple(p.shape[1:]), lambda bi, li: (li, 0, 0)))

    out_spec = pl.BlockSpec((NB, S, D), lambda bi, li: (bi, 0, 0))

    kernel = functools.partial(
        encoder_stack_kernel,
        nhead=nhead, head_dim=head_dim,
        compute_dtype=compute_dtype,
        approx_recip=(compute_dtype != jnp.float32))

    out = pl.pallas_call(
        kernel,
        out_shape=jax.ShapeDtypeStruct((B, S, D), out_dtype),
        grid_spec=pltpu.PrefetchScalarGridSpec(
            num_scalar_prefetch=0,
            grid=(B // NB, L),                   # batch tiles outer, layers inner
            in_specs=in_specs,
            out_specs=out_spec,
            scratch_shapes=[
                pltpu.VMEM((NB, S, D), jnp.float32),     # resident activation
                pltpu.VMEM((NB, S, D), compute_dtype),   # head-major attention output
            ],
        ),
        compiler_params=pltpu.CompilerParams(
            dimension_semantics=("parallel", "arbitrary"),
            vmem_limit_bytes=vmem_limit),
    )(x, bias, *params)

    return out if S == S0 else out[:, :S0, :]


# --------------------------------------------------------------------------
# Pure-JAX reference (same math) for the correctness check.
# --------------------------------------------------------------------------
def reference_encoder(src, mask, layer_params, *, nhead):
    bias = jnp.where(mask, -1e9, 0.0)[:, None, :]           # (B,1,S)
    x = src.astype(jnp.float32)
    for p in layer_params:
        D = x.shape[-1]
        hd = D // nhead
        q = x @ p["wq"] + p["bq"]
        k = x @ p["wk"] + p["bk"]
        v = x @ p["wv"] + p["bv"]
        heads = []
        for h in range(nhead):
            sl = slice(h * hd, (h + 1) * hd)
            s = jnp.einsum("bqd,bkd->bqk", q[..., sl] / math.sqrt(hd), k[..., sl]) + bias
            a = jax.nn.softmax(s, axis=-1)
            heads.append(jnp.einsum("bqk,bkd->bqd", a, v[..., sl]))
        attn = jnp.concatenate(heads, -1) @ p["wo"] + p["bo"]

        def ln(v_, w, b, eps=1e-5):
            mu = jnp.mean(v_, -1, keepdims=True)
            var = jnp.mean((v_ - mu) ** 2, -1, keepdims=True)
            return (v_ - mu) / jnp.sqrt(var + eps) * w + b

        y = ln(x + attn, p["ln1w"], p["ln1b"])
        h1 = jnp.maximum(y @ p["w1"] + p["b1"], 0.0)
        x = ln(y + h1 @ p["w2"] + p["b2"], p["ln2w"], p["ln2b"])
    return x


# --------------------------------------------------------------------------
# Deterministic parameter construction (shapes mirror nn.TransformerEncoderLayer,
# weights stored pre-transposed so the kernel computes x @ W).
# --------------------------------------------------------------------------
def make_params(key, num_layers, d_model, dim_feedforward):
    layer_params = []
    for l in range(num_layers):
        keys = jax.random.split(jax.random.fold_in(key, l), 8)
        s = 0.05
        p = dict(
            wq=jax.random.normal(keys[0], (d_model, d_model), jnp.float32) * s,
            wk=jax.random.normal(keys[1], (d_model, d_model), jnp.float32) * s,
            wv=jax.random.normal(keys[2], (d_model, d_model), jnp.float32) * s,
            bq=jax.random.normal(keys[3], (1, d_model), jnp.float32) * s,
            bk=jnp.zeros((1, d_model), jnp.float32),
            bv=jnp.zeros((1, d_model), jnp.float32),
            wo=jax.random.normal(keys[4], (d_model, d_model), jnp.float32) * s,
            bo=jnp.zeros((1, d_model), jnp.float32),
            ln1w=jnp.ones((1, d_model), jnp.float32),
            ln1b=jnp.zeros((1, d_model), jnp.float32),
            w1=jax.random.normal(keys[5], (d_model, dim_feedforward), jnp.float32) * s,
            b1=jax.random.normal(keys[6], (1, dim_feedforward), jnp.float32) * s,
            w2=jax.random.normal(keys[7], (dim_feedforward, d_model), jnp.float32) * s,
            b2=jnp.zeros((1, d_model), jnp.float32),
            ln2w=jnp.ones((1, d_model), jnp.float32),
            ln2b=jnp.zeros((1, d_model), jnp.float32),
        )
        layer_params.append(p)
    return layer_params


if __name__ == "__main__":
    # Small config consistent with the module's constructor.
    B, S = 2, 8
    d_model, nhead, num_layers, dim_feedforward = 32, 4, 2, 64

    key = jax.random.PRNGKey(0)
    k_src, k_par = jax.random.split(key)

    src = jax.random.normal(k_src, (B, S, d_model), jnp.float32)
    # key padding mask: True means "pad / ignore this position"
    pad = jnp.array([[False] * 6 + [True] * 2,
                     [False] * 5 + [True] * 3], dtype=bool)     # (B, S)

    params = make_params(k_par, num_layers, d_model, dim_feedforward)
    ref = reference_encoder(src, pad, params, nhead=nhead)

    # Exact-math path (f32 matmuls): tight correctness check vs. reference.
    out_f32 = transformer_encoder_pallas(src, pad, params, nhead=nhead,
                                         compute_dtype=jnp.float32)
    out_f32 = jax.block_until_ready(out_f32)
    assert out_f32.shape == (B, S, d_model)
    assert jnp.allclose(out_f32, ref, atol=1e-4, rtol=1e-4), "f32 kernel mismatch"

    # Performance path (bf16 MXU matmuls, f32 accumulation / softmax / LayerNorm).
    out_bf16 = transformer_encoder_pallas(src, pad, params, nhead=nhead,
                                          compute_dtype=jnp.bfloat16)
    out_bf16 = jax.block_until_ready(out_bf16)
    assert out_bf16.shape == (B, S, d_model)
    assert jnp.allclose(out_bf16, ref, atol=5e-2, rtol=5e-2), "bf16 kernel mismatch"

    print("KERNEL_OK")
</pallas_src>

<mosaic_0001>
module attributes {stable_mosaic.version = 11 : i64} {
  func.func @encoder_stack_kernel(%arg0: i32, %arg1: i32, %arg2: memref<1x8x32xf32, #tpu.memory_space<vmem>>, %arg3: memref<1x1x8xf32, #tpu.memory_space<vmem>>, %arg4: memref<1x32x96xf32, #tpu.memory_space<vmem>>, %arg5: memref<1x1x96xf32, #tpu.memory_space<vmem>>, %arg6: memref<1x32x32xf32, #tpu.memory_space<vmem>>, %arg7: memref<1x1x32xf32, #tpu.memory_space<vmem>>, %arg8: memref<1x1x32xf32, #tpu.memory_space<vmem>>, %arg9: memref<1x1x32xf32, #tpu.memory_space<vmem>>, %arg10: memref<1x32x64xf32, #tpu.memory_space<vmem>>, %arg11: memref<1x1x64xf32, #tpu.memory_space<vmem>>, %arg12: memref<1x64x32xf32, #tpu.memory_space<vmem>>, %arg13: memref<1x1x32xf32, #tpu.memory_space<vmem>>, %arg14: memref<1x1x32xf32, #tpu.memory_space<vmem>>, %arg15: memref<1x1x32xf32, #tpu.memory_space<vmem>>, %arg16: memref<1x8x32xf32, #tpu.memory_space<vmem>>, %arg17: memref<1x8x32xf32, #tpu.memory_space<vmem>>, %arg18: memref<1x8x32xf32, #tpu.memory_space<vmem>>) attributes {dimension_semantics = [#tpu.dimension_semantics<parallel>, #tpu.dimension_semantics<arbitrary>], iteration_bounds = array<i64: 2, 2>, scalar_prefetch = 0 : i64, scratch_operands = 2 : i64, tpu.core_type = #tpu.core_type<tc>, window_params = [{transform_indices = @transform_0, window_bounds = array<i64: 1, 8, 32>}, {transform_indices = @transform_1, window_bounds = array<i64: 1, 1, 8>}, {transform_indices = @transform_2, window_bounds = array<i64: 1, 32, 96>}, {transform_indices = @transform_3, window_bounds = array<i64: 1, 1, 96>}, {transform_indices = @transform_4, window_bounds = array<i64: 1, 32, 32>}, {transform_indices = @transform_5, window_bounds = array<i64: 1, 1, 32>}, {transform_indices = @transform_6, window_bounds = array<i64: 1, 1, 32>}, {transform_indices = @transform_7, window_bounds = array<i64: 1, 1, 32>}, {transform_indices = @transform_8, window_bounds = array<i64: 1, 32, 64>}, {transform_indices = @transform_9, window_bounds = array<i64: 1, 1, 64>}, {transform_indices = @transform_10, window_bounds = array<i64: 1, 64, 32>}, {transform_indices = @transform_11, window_bounds = array<i64: 1, 1, 32>}, {transform_indices = @transform_12, window_bounds = array<i64: 1, 1, 32>}, {transform_indices = @transform_13, window_bounds = array<i64: 1, 1, 32>}, {transform_indices = @transform_14, window_bounds = array<i64: 1, 8, 32>}]} {
    %c0_i32 = arith.constant 0 : i32
    %0 = arith.cmpi eq, %arg1, %c0_i32 : i32
    %1 = arith.extui %0 : i1 to i32
    %c0_i32_0 = arith.constant 0 : i32
    %2 = arith.cmpi ne, %1, %c0_i32_0 : i32
    scf.if %2 {
      %c0_88 = arith.constant 0 : index
      %c0_89 = arith.constant 0 : index
      %c0_90 = arith.constant 0 : index
      %188 = vector.load %arg2[%c0_88, %c0_89, %c0_90] : memref<1x8x32xf32, #tpu.memory_space<vmem>>, vector<1x8x32xf32>
      %c0_91 = arith.constant 0 : index
      %c0_92 = arith.constant 0 : index
      %c0_93 = arith.constant 0 : index
      %189 = vector.load %arg17[%c0_91, %c0_92, %c0_93] : memref<1x8x32xf32, #tpu.memory_space<vmem>>, vector<1x8x32xf32>
      tpu.vector_store %arg17[%c0_91, %c0_92, %c0_93], %188 {strides = array<i32>} : memref<1x8x32xf32, #tpu.memory_space<vmem>>, vector<1x8x32xf32>,
    } else {
    }
    %c0 = arith.constant 0 : index
    %c0_1 = arith.constant 0 : index
    %c0_2 = arith.constant 0 : index
    %3 = vector.load %arg17[%c0, %c0_1, %c0_2] : memref<1x8x32xf32, #tpu.memory_space<vmem>>, vector<1x8x32xf32>
    %4 = vector.shape_cast %3 : vector<1x8x32xf32> to vector<8x32xf32>
    %c0_3 = arith.constant 0 : index
    %c0_4 = arith.constant 0 : index
    %c0_5 = arith.constant 0 : index
    %5 = vector.load %arg4[%c0_3, %c0_4, %c0_5] : memref<1x32x96xf32, #tpu.memory_space<vmem>>, vector<1x32x96xf32>
    %6 = vector.shape_cast %5 : vector<1x32x96xf32> to vector<32x96xf32>
    %cst = arith.constant dense<0.000000e+00> : vector<8x96xf32>
    %7 = tpu.matmul %4, %6, %cst {dimension_numbers = #tpu.dot_dimension_numbers<[1], [0], [0], [1], [0, 0, 1, 1], [], []>} : vector<8x32xf32>, vector<32x96xf32>, vector<8x96xf32> -> vector<8x96xf32>
    %c0_6 = arith.constant 0 : index
    %c0_7 = arith.constant 0 : index
    %c0_8 = arith.constant 0 : index
    %8 = vector.load %arg5[%c0_6, %c0_7, %c0_8] : memref<1x1x96xf32, #tpu.memory_space<vmem>>, vector<1x1x96xf32>
    %9 = vector.shape_cast %8 : vector<1x1x96xf32> to vector<1x96xf32>
    %10 = vector.broadcast %9 : vector<1x96xf32> to vector<8x96xf32>
    %11 = arith.addf %7, %10 : vector<8x96xf32>
    %c0_9 = arith.constant 0 : index
    %c0_10 = arith.constant 0 : index
    %c0_11 = arith.constant 0 : index
    %12 = vector.load %arg3[%c0_9, %c0_10, %c0_11] : memref<1x1x8xf32, #tpu.memory_space<vmem>>, vector<1x1x8xf32>
    %13 = vector.extract_strided_slice %11 {offsets = [0, 0], sizes = [8, 8], strides = [1, 1]} : vector<8x96xf32> to vector<8x8xf32>
    %14 = vector.shape_cast %13 : vector<8x8xf32> to vector<1x8x8xf32>
    %15 = vector.extract_strided_slice %11 {offsets = [0, 32], sizes = [8, 8], strides = [1, 1]} : vector<8x96xf32> to vector<8x8xf32>
    %16 = vector.shape_cast %15 : vector<8x8xf32> to vector<1x8x8xf32>
    %17 = vector.extract_strided_slice %11 {offsets = [0, 64], sizes = [8, 8], strides = [1, 1]} : vector<8x96xf32> to vector<8x8xf32>
    %18 = vector.shape_cast %17 : vector<8x8xf32> to vector<1x8x8xf32>
    "tpu.trace_start"() <{level = 10 : i32, message = "bqd,bkd->bqk"}> : () -> ()
    %cst_12 = arith.constant dense<0.000000e+00> : vector<1x8x8xf32>
    %19 = tpu.matmul %14, %16, %cst_12 {dimension_numbers = #tpu.dot_dimension_numbers<[2], [2], [1], [1], [0, 0, 0, 1, 1, 1], [0], [0]>} : vector<1x8x8xf32>, vector<1x8x8xf32>, vector<1x8x8xf32> -> vector<1x8x8xf32>
    "tpu.trace_stop"() : () -> ()
    %20 = vector.broadcast %12 : vector<1x1x8xf32> to vector<1x8x8xf32>
    %21 = arith.addf %19, %20 : vector<1x8x8xf32>
    %cst_13 = arith.constant dense<0xFF800000> : vector<1x8xf32>
    %22 = vector.multi_reduction <maximumf>, %21, %cst_13 [2] : vector<1x8x8xf32> to vector<1x8xf32>
    %23 = vector.shape_cast %22 : vector<1x8xf32> to vector<1x8x1xf32>
    %24 = vector.broadcast %23 : vector<1x8x1xf32> to vector<1x8x8xf32>
    %25 = arith.subf %21, %24 : vector<1x8x8xf32>
    %26 = math.exp %25 : vector<1x8x8xf32>
    %cst_14 = arith.constant dense<0.000000e+00> : vector<1x8xf32>
    %27 = vector.multi_reduction <add>, %26, %cst_14 [2] : vector<1x8x8xf32> to vector<1x8xf32>
    %28 = vector.shape_cast %27 : vector<1x8xf32> to vector<1x8x1xf32>
    %29 = tpu.reciprocal %28 : vector<1x8x1xf32> -> vector<1x8x1xf32>
    %30 = vector.broadcast %29 : vector<1x8x1xf32> to vector<1x8x8xf32>
    %31 = arith.mulf %26, %30 : vector<1x8x8xf32>
    "tpu.trace_start"() <{level = 10 : i32, message = "bqk,bkd->bqd"}> : () -> ()
    %cst_15 = arith.constant dense<0.000000e+00> : vector<1x8x8xf32>
    %32 = tpu.matmul %31, %18, %cst_15 {dimension_numbers = #tpu.dot_dimension_numbers<[2], [1], [1], [2], [0, 0, 0, 1, 1, 2], [0], [0]>} : vector<1x8x8xf32>, vector<1x8x8xf32>, vector<1x8x8xf32> -> vector<1x8x8xf32>
    "tpu.trace_stop"() : () -> ()
    %c0_16 = arith.constant 0 : index
    %c0_17 = arith.constant 0 : index
    %c0_18 = arith.constant 0 : index
    %33 = vector.load %arg18[%c0_16, %c0_17, %c0_18] : memref<1x8x32xf32, #tpu.memory_space<vmem>>, vector<1x8x8xf32>
    tpu.vector_store %arg18[%c0_16, %c0_17, %c0_18], %32 {strides = array<i32>} : memref<1x8x32xf32, #tpu.memory_space<vmem>>, vector<1x8x8xf32>,
    %34 = vector.extract_strided_slice %11 {offsets = [0, 8], sizes = [8, 8], strides = [1, 1]} : vector<8x96xf32> to vector<8x8xf32>
    %35 = vector.shape_cast %34 : vector<8x8xf32> to vector<1x8x8xf32>
    %36 = vector.extract_strided_slice %11 {offsets = [0, 40], sizes = [8, 8], strides = [1, 1]} : vector<8x96xf32> to vector<8x8xf32>
    %37 = vector.shape_cast %36 : vector<8x8xf32> to vector<1x8x8xf32>
    %38 = vector.extract_strided_slice %11 {offsets = [0, 72], sizes = [8, 8], strides = [1, 1]} : vector<8x96xf32> to vector<8x8xf32>
    %39 = vector.shape_cast %38 : vector<8x8xf32> to vector<1x8x8xf32>
    "tpu.trace_start"() <{level = 10 : i32, message = "bqd,bkd->bqk"}> : () -> ()
    %cst_19 = arith.constant dense<0.000000e+00> : vector<1x8x8xf32>
    %40 = tpu.matmul %35, %37, %cst_19 {dimension_numbers = #tpu.dot_dimension_numbers<[2], [2], [1], [1], [0, 0, 0, 1, 1, 1], [0], [0]>} : vector<1x8x8xf32>, vector<1x8x8xf32>, vector<1x8x8xf32> -> vector<1x8x8xf32>
    "tpu.trace_stop"() : () -> ()
    %41 = vector.broadcast %12 : vector<1x1x8xf32> to vector<1x8x8xf32>
    %42 = arith.addf %40, %41 : vector<1x8x8xf32>
    %cst_20 = arith.constant dense<0xFF800000> : vector<1x8xf32>
    %43 = vector.multi_reduction <maximumf>, %42, %cst_20 [2] : vector<1x8x8xf32> to vector<1x8xf32>
    %44 = vector.shape_cast %43 : vector<1x8xf32> to vector<1x8x1xf32>
    %45 = vector.broadcast %44 : vector<1x8x1xf32> to vector<1x8x8xf32>
    %46 = arith.subf %42, %45 : vector<1x8x8xf32>
    %47 = math.exp %46 : vector<1x8x8xf32>
    %cst_21 = arith.constant dense<0.000000e+00> : vector<1x8xf32>
    %48 = vector.multi_reduction <add>, %47, %cst_21 [2] : vector<1x8x8xf32> to vector<1x8xf32>
    %49 = vector.shape_cast %48 : vector<1x8xf32> to vector<1x8x1xf32>
    %50 = tpu.reciprocal %49 : vector<1x8x1xf32> -> vector<1x8x1xf32>
    %51 = vector.broadcast %50 : vector<1x8x1xf32> to vector<1x8x8xf32>
    %52 = arith.mulf %47, %51 : vector<1x8x8xf32>
    "tpu.trace_start"() <{level = 10 : i32, message = "bqk,bkd->bqd"}> : () -> ()
    %cst_22 = arith.constant dense<0.000000e+00> : vector<1x8x8xf32>
    %53 = tpu.matmul %52, %39, %cst_22 {dimension_numbers = #tpu.dot_dimension_numbers<[2], [1], [1], [2], [0, 0, 0, 1, 1, 2], [0], [0]>} : vector<1x8x8xf32>, vector<1x8x8xf32>, vector<1x8x8xf32> -> vector<1x8x8xf32>
    "tpu.trace_stop"() : () -> ()
    %c0_23 = arith.constant 0 : index
    %c0_24 = arith.constant 0 : index
    %c8 = arith.constant 8 : index
    %54 = vector.load %arg18[%c0_23, %c0_24, %c8] : memref<1x8x32xf32, #tpu.memory_space<vmem>>, vector<1x8x8xf32>
    tpu.vector_store %arg18[%c0_23, %c0_24, %c8], %53 {strides = array<i32>} : memref<1x8x32xf32, #tpu.memory_space<vmem>>, vector<1x8x8xf32>,
    %55 = vector.extract_strided_slice %11 {offsets = [0, 16], sizes = [8, 8], strides = [1, 1]} : vector<8x96xf32> to vector<8x8xf32>
    %56 = vector.shape_cast %55 : vector<8x8xf32> to vector<1x8x8xf32>
    %57 = vector.extract_strided_slice %11 {offsets = [0, 48], sizes = [8, 8], strides = [1, 1]} : vector<8x96xf32> to vector<8x8xf32>
    %58 = vector.shape_cast %57 : vector<8x8xf32> to vector<1x8x8xf32>
    %59 = vector.extract_strided_slice %11 {offsets = [0, 80], sizes = [8, 8], strides = [1, 1]} : vector<8x96xf32> to vector<8x8xf32>
    %60 = vector.shape_cast %59 : vector<8x8xf32> to vector<1x8x8xf32>
    "tpu.trace_start"() <{level = 10 : i32, message = "bqd,bkd->bqk"}> : () -> ()
    %cst_25 = arith.constant dense<0.000000e+00> : vector<1x8x8xf32>
    %61 = tpu.matmul %56, %58, %cst_25 {dimension_numbers = #tpu.dot_dimension_numbers<[2], [2], [1], [1], [0, 0, 0, 1, 1, 1], [0], [0]>} : vector<1x8x8xf32>, vector<1x8x8xf32>, vector<1x8x8xf32> -> vector<1x8x8xf32>
    "tpu.trace_stop"() : () -> ()
    %62 = vector.broadcast %12 : vector<1x1x8xf32> to vector<1x8x8xf32>
    %63 = arith.addf %61, %62 : vector<1x8x8xf32>
    %cst_26 = arith.constant dense<0xFF800000> : vector<1x8xf32>
    %64 = vector.multi_reduction <maximumf>, %63, %cst_26 [2] : vector<1x8x8xf32> to vector<1x8xf32>
    %65 = vector.shape_cast %64 : vector<1x8xf32> to vector<1x8x1xf32>
    %66 = vector.broadcast %65 : vector<1x8x1xf32> to vector<1x8x8xf32>
    %67 = arith.subf %63, %66 : vector<1x8x8xf32>
    %68 = math.exp %67 : vector<1x8x8xf32>
    %cst_27 = arith.constant dense<0.000000e+00> : vector<1x8xf32>
    %69 = vector.multi_reduction <add>, %68, %cst_27 [2] : vector<1x8x8xf32> to vector<1x8xf32>
    %70 = vector.shape_cast %69 : vector<1x8xf32> to vector<1x8x1xf32>
    %71 = tpu.reciprocal %70 : vector<1x8x1xf32> -> vector<1x8x1xf32>
    %72 = vector.broadcast %71 : vector<1x8x1xf32> to vector<1x8x8xf32>
    %73 = arith.mulf %68, %72 : vector<1x8x8xf32>
    "tpu.trace_start"() <{level = 10 : i32, message = "bqk,bkd->bqd"}> : () -> ()
    %cst_28 = arith.constant dense<0.000000e+00> : vector<1x8x8xf32>
    %74 = tpu.matmul %73, %60, %cst_28 {dimension_numbers = #tpu.dot_dimension_numbers<[2], [1], [1], [2], [0, 0, 0, 1, 1, 2], [0], [0]>} : vector<1x8x8xf32>, vector<1x8x8xf32>, vector<1x8x8xf32> -> vector<1x8x8xf32>
    "tpu.trace_stop"() : () -> ()
    %c0_29 = arith.constant 0 : index
    %c0_30 = arith.constant 0 : index
    %c16 = arith.constant 16 : index
    %75 = vector.load %arg18[%c0_29, %c0_30, %c16] : memref<1x8x32xf32, #tpu.memory_space<vmem>>, vector<1x8x8xf32>
    tpu.vector_store %arg18[%c0_29, %c0_30, %c16], %74 {strides = array<i32>} : memref<1x8x32xf32, #tpu.memory_space<vmem>>, vector<1x8x8xf32>,
    %76 = vector.extract_strided_slice %11 {offsets = [0, 24], sizes = [8, 8], strides = [1, 1]} : vector<8x96xf32> to vector<8x8xf32>
    %77 = vector.shape_cast %76 : vector<8x8xf32> to vector<1x8x8xf32>
    %78 = vector.extract_strided_slice %11 {offsets = [0, 56], sizes = [8, 8], strides = [1, 1]} : vector<8x96xf32> to vector<8x8xf32>
    %79 = vector.shape_cast %78 : vector<8x8xf32> to vector<1x8x8xf32>
    %80 = vector.extract_strided_slice %11 {offsets = [0, 88], sizes = [8, 8], strides = [1, 1]} : vector<8x96xf32> to vector<8x8xf32>
    %81 = vector.shape_cast %80 : vector<8x8xf32> to vector<1x8x8xf32>
    "tpu.trace_start"() <{level = 10 : i32, message = "bqd,bkd->bqk"}> : () -> ()
    %cst_31 = arith.constant dense<0.000000e+00> : vector<1x8x8xf32>
    %82 = tpu.matmul %77, %79, %cst_31 {dimension_numbers = #tpu.dot_dimension_numbers<[2], [2], [1], [1], [0, 0, 0, 1, 1, 1], [0], [0]>} : vector<1x8x8xf32>, vector<1x8x8xf32>, vector<1x8x8xf32> -> vector<1x8x8xf32>
    "tpu.trace_stop"() : () -> ()
    %83 = vector.broadcast %12 : vector<1x1x8xf32> to vector<1x8x8xf32>
    %84 = arith.addf %82, %83 : vector<1x8x8xf32>
    %cst_32 = arith.constant dense<0xFF800000> : vector<1x8xf32>
    %85 = vector.multi_reduction <maximumf>, %84, %cst_32 [2] : vector<1x8x8xf32> to vector<1x8xf32>
    %86 = vector.shape_cast %85 : vector<1x8xf32> to vector<1x8x1xf32>
    %87 = vector.broadcast %86 : vector<1x8x1xf32> to vector<1x8x8xf32>
    %88 = arith.subf %84, %87 : vector<1x8x8xf32>
    %89 = math.exp %88 : vector<1x8x8xf32>
    %cst_33 = arith.constant dense<0.000000e+00> : vector<1x8xf32>
    %90 = vector.multi_reduction <add>, %89, %cst_33 [2] : vector<1x8x8xf32> to vector<1x8xf32>
    %91 = vector.shape_cast %90 : vector<1x8xf32> to vector<1x8x1xf32>
    %92 = tpu.reciprocal %91 : vector<1x8x1xf32> -> vector<1x8x1xf32>
    %93 = vector.broadcast %92 : vector<1x8x1xf32> to vector<1x8x8xf32>
    %94 = arith.mulf %89, %93 : vector<1x8x8xf32>
    "tpu.trace_start"() <{level = 10 : i32, message = "bqk,bkd->bqd"}> : () -> ()
    %cst_34 = arith.constant dense<0.000000e+00> : vector<1x8x8xf32>
    %95 = tpu.matmul %94, %81, %cst_34 {dimension_numbers = #tpu.dot_dimension_numbers<[2], [1], [1], [2], [0, 0, 0, 1, 1, 2], [0], [0]>} : vector<1x8x8xf32>, vector<1x8x8xf32>, vector<1x8x8xf32> -> vector<1x8x8xf32>
    "tpu.trace_stop"() : () -> ()
    %c0_35 = arith.constant 0 : index
    %c0_36 = arith.constant 0 : index
    %c24 = arith.constant 24 : index
    %96 = vector.load %arg18[%c0_35, %c0_36, %c24] : memref<1x8x32xf32, #tpu.memory_space<vmem>>, vector<1x8x8xf32>
    tpu.vector_store %arg18[%c0_35, %c0_36, %c24], %95 {strides = array<i32>} : memref<1x8x32xf32, #tpu.memory_space<vmem>>, vector<1x8x8xf32>,
    %c0_37 = arith.constant 0 : index
    %c0_38 = arith.constant 0 : index
    %c0_39 = arith.constant 0 : index
    %97 = vector.load %arg18[%c0_37, %c0_38, %c0_39] : memref<1x8x32xf32, #tpu.memory_space<vmem>>, vector<1x8x32xf32>
    %98 = vector.shape_cast %97 : vector<1x8x32xf32> to vector<8x32xf32>
    %c0_40 = arith.constant 0 : index
    %c0_41 = arith.constant 0 : index
    %c0_42 = arith.constant 0 : index
    %99 = vector.load %arg6[%c0_40, %c0_41, %c0_42] : memref<1x32x32xf32, #tpu.memory_space<vmem>>, vector<1x32x32xf32>
    %100 = vector.shape_cast %99 : vector<1x32x32xf32> to vector<32x32xf32>
    %cst_43 = arith.constant dense<0.000000e+00> : vector<8x32xf32>
    %101 = tpu.matmul %98, %100, %cst_43 {dimension_numbers = #tpu.dot_dimension_numbers<[1], [0], [0], [1], [0, 0, 1, 1], [], []>} : vector<8x32xf32>, vector<32x32xf32>, vector<8x32xf32> -> vector<8x32xf32>
    %102 = vector.shape_cast %101 : vector<8x32xf32> to vector<1x8x32xf32>
    %c0_44 = arith.constant 0 : index
    %c0_45 = arith.constant 0 : index
    %c0_46 = arith.constant 0 : index
    %103 = vector.load %arg7[%c0_44, %c0_45, %c0_46] : memref<1x1x32xf32, #tpu.memory_space<vmem>>, vector<1x1x32xf32>
    %104 = vector.shape_cast %103 : vector<1x1x32xf32> to vector<1x32xf32>
    %105 = vector.shape_cast %104 : vector<1x32xf32> to vector<1x1x32xf32>
    %106 = vector.broadcast %105 : vector<1x1x32xf32> to vector<1x8x32xf32>
    %107 = arith.addf %102, %106 : vector<1x8x32xf32>
    %108 = arith.addf %3, %107 : vector<1x8x32xf32>
    %c0_47 = arith.constant 0 : index
    %c0_48 = arith.constant 0 : index
    %c0_49 = arith.constant 0 : index
    %109 = vector.load %arg8[%c0_47, %c0_48, %c0_49] : memref<1x1x32xf32, #tpu.memory_space<vmem>>, vector<1x1x32xf32>
    %110 = vector.shape_cast %109 : vector<1x1x32xf32> to vector<1x32xf32>
    %c0_50 = arith.constant 0 : index
    %c0_51 = arith.constant 0 : index
    %c0_52 = arith.constant 0 : index
    %111 = vector.load %arg9[%c0_50, %c0_51, %c0_52] : memref<1x1x32xf32, #tpu.memory_space<vmem>>, vector<1x1x32xf32>
    %112 = vector.shape_cast %111 : vector<1x1x32xf32> to vector<1x32xf32>
    %cst_53 = arith.constant dense<0.000000e+00> : vector<1x8xf32>
    %113 = vector.multi_reduction <add>, %108, %cst_53 [2] : vector<1x8x32xf32> to vector<1x8xf32>
    %114 = vector.shape_cast %113 : vector<1x8xf32> to vector<1x8x1xf32>
    %cst_54 = arith.constant 3.200000e+01 : f32
    %115 = vector.broadcast %cst_54 : f32 to vector<1x8x1xf32>
    %116 = arith.divf %114, %115 : vector<1x8x1xf32>
    %117 = vector.broadcast %116 : vector<1x8x1xf32> to vector<1x8x32xf32>
    %118 = arith.subf %108, %117 : vector<1x8x32xf32>
    %119 = arith.mulf %118, %118 : vector<1x8x32xf32>
    %cst_55 = arith.constant dense<0.000000e+00> : vector<1x8xf32>
    %120 = vector.multi_reduction <add>, %119, %cst_55 [2] : vector<1x8x32xf32> to vector<1x8xf32>
    %121 = vector.shape_cast %120 : vector<1x8xf32> to vector<1x8x1xf32>
    %cst_56 = arith.constant 3.200000e+01 : f32
    %122 = vector.broadcast %cst_56 : f32 to vector<1x8x1xf32>
    %123 = arith.divf %121, %122 : vector<1x8x1xf32>
    %124 = vector.broadcast %116 : vector<1x8x1xf32> to vector<1x8x32xf32>
    %125 = arith.subf %108, %124 : vector<1x8x32xf32>
    %cst_57 = arith.constant 9.99999974E-6 : f32
    %126 = vector.broadcast %cst_57 : f32 to vector<1x8x1xf32>
    %127 = arith.addf %123, %126 : vector<1x8x1xf32>
    %128 = math.rsqrt %127 : vector<1x8x1xf32>
    %129 = vector.broadcast %128 : vector<1x8x1xf32> to vector<1x8x32xf32>
    %130 = arith.mulf %125, %129 : vector<1x8x32xf32>
    %131 = vector.shape_cast %110 : vector<1x32xf32> to vector<1x1x32xf32>
    %132 = vector.broadcast %131 : vector<1x1x32xf32> to vector<1x8x32xf32>
    %133 = arith.mulf %130, %132 : vector<1x8x32xf32>
    %134 = vector.shape_cast %112 : vector<1x32xf32> to vector<1x1x32xf32>
    %135 = vector.broadcast %134 : vector<1x1x32xf32> to vector<1x8x32xf32>
    %136 = arith.addf %133, %135 : vector<1x8x32xf32>
    %137 = vector.shape_cast %136 : vector<1x8x32xf32> to vector<8x32xf32>
    %c0_58 = arith.constant 0 : index
    %c0_59 = arith.constant 0 : index
    %c0_60 = arith.constant 0 : index
    %138 = vector.load %arg10[%c0_58, %c0_59, %c0_60] : memref<1x32x64xf32, #tpu.memory_space<vmem>>, vector<1x32x64xf32>
    %139 = vector.shape_cast %138 : vector<1x32x64xf32> to vector<32x64xf32>
    %cst_61 = arith.constant dense<0.000000e+00> : vector<8x64xf32>
    %140 = tpu.matmul %137, %139, %cst_61 {dimension_numbers = #tpu.dot_dimension_numbers<[1], [0], [0], [1], [0, 0, 1, 1], [], []>} : vector<8x32xf32>, vector<32x64xf32>, vector<8x64xf32> -> vector<8x64xf32>
    %c0_62 = arith.constant 0 : index
    %c0_63 = arith.constant 0 : index
    %c0_64 = arith.constant 0 : index
    %141 = vector.load %arg11[%c0_62, %c0_63, %c0_64] : memref<1x1x64xf32, #tpu.memory_space<vmem>>, vector<1x1x64xf32>
    %142 = vector.shape_cast %141 : vector<1x1x64xf32> to vector<1x64xf32>
    %143 = vector.broadcast %142 : vector<1x64xf32> to vector<8x64xf32>
    %144 = arith.addf %140, %143 : vector<8x64xf32>
    %cst_65 = arith.constant 0.000000e+00 : f32
    %145 = vector.broadcast %cst_65 : f32 to vector<8x64xf32>
    %146 = arith.maximumf %144, %145 : vector<8x64xf32>
    %c0_66 = arith.constant 0 : index
    %c0_67 = arith.constant 0 : index
    %c0_68 = arith.constant 0 : index
    %147 = vector.load %arg12[%c0_66, %c0_67, %c0_68] : memref<1x64x32xf32, #tpu.memory_space<vmem>>, vector<1x64x32xf32>
    %148 = vector.shape_cast %147 : vector<1x64x32xf32> to vector<64x32xf32>
    %cst_69 = arith.constant dense<0.000000e+00> : vector<8x32xf32>
    %149 = tpu.matmul %146, %148, %cst_69 {dimension_numbers = #tpu.dot_dimension_numbers<[1], [0], [0], [1], [0, 0, 1, 1], [], []>} : vector<8x64xf32>, vector<64x32xf32>, vector<8x32xf32> -> vector<8x32xf32>
    %c0_70 = arith.constant 0 : index
    %c0_71 = arith.constant 0 : index
    %c0_72 = arith.constant 0 : index
    %150 = vector.load %arg13[%c0_70, %c0_71, %c0_72] : memref<1x1x32xf32, #tpu.memory_space<vmem>>, vector<1x1x32xf32>
    %151 = vector.shape_cast %150 : vector<1x1x32xf32> to vector<1x32xf32>
    %152 = vector.broadcast %151 : vector<1x32xf32> to vector<8x32xf32>
    %153 = arith.addf %149, %152 : vector<8x32xf32>
    %154 = vector.shape_cast %153 : vector<8x32xf32> to vector<1x8x32xf32>
    %155 = arith.addf %136, %154 : vector<1x8x32xf32>
    %c0_73 = arith.constant 0 : index
    %c0_74 = arith.constant 0 : index
    %c0_75 = arith.constant 0 : index
    %156 = vector.load %arg14[%c0_73, %c0_74, %c0_75] : memref<1x1x32xf32, #tpu.memory_space<vmem>>, vector<1x1x32xf32>
    %157 = vector.shape_cast %156 : vector<1x1x32xf32> to vector<1x32xf32>
    %c0_76 = arith.constant 0 : index
    %c0_77 = arith.constant 0 : index
    %c0_78 = arith.constant 0 : index
    %158 = vector.load %arg15[%c0_76, %c0_77, %c0_78] : memref<1x1x32xf32, #tpu.memory_space<vmem>>, vector<1x1x32xf32>
    %159 = vector.shape_cast %158 : vector<1x1x32xf32> to vector<1x32xf32>
    %cst_79 = arith.constant dense<0.000000e+00> : vector<1x8xf32>
    %160 = vector.multi_reduction <add>, %155, %cst_79 [2] : vector<1x8x32xf32> to vector<1x8xf32>
    %161 = vector.shape_cast %160 : vector<1x8xf32> to vector<1x8x1xf32>
    %cst_80 = arith.constant 3.200000e+01 : f32
    %162 = vector.broadcast %cst_80 : f32 to vector<1x8x1xf32>
    %163 = arith.divf %161, %162 : vector<1x8x1xf32>
    %164 = vector.broadcast %163 : vector<1x8x1xf32> to vector<1x8x32xf32>
    %165 = arith.subf %155, %164 : vector<1x8x32xf32>
    %166 = arith.mulf %165, %165 : vector<1x8x32xf32>
    %cst_81 = arith.constant dense<0.000000e+00> : vector<1x8xf32>
    %167 = vector.multi_reduction <add>, %166, %cst_81 [2] : vector<1x8x32xf32> to vector<1x8xf32>
    %168 = vector.shape_cast %167 : vector<1x8xf32> to vector<1x8x1xf32>
    %cst_82 = arith.constant 3.200000e+01 : f32
    %169 = vector.broadcast %cst_82 : f32 to vector<1x8x1xf32>
    %170 = arith.divf %168, %169 : vector<1x8x1xf32>
    %171 = vector.broadcast %163 : vector<1x8x1xf32> to vector<1x8x32xf32>
    %172 = arith.subf %155, %171 : vector<1x8x32xf32>
    %cst_83 = arith.constant 9.99999974E-6 : f32
    %173 = vector.broadcast %cst_83 : f32 to vector<1x8x1xf32>
    %174 = arith.addf %170, %173 : vector<1x8x1xf32>
    %175 = math.rsqrt %174 : vector<1x8x1xf32>
    %176 = vector.broadcast %175 : vector<1x8x1xf32> to vector<1x8x32xf32>
    %177 = arith.mulf %172, %176 : vector<1x8x32xf32>
    %178 = vector.shape_cast %157 : vector<1x32xf32> to vector<1x1x32xf32>
    %179 = vector.broadcast %178 : vector<1x1x32xf32> to vector<1x8x32xf32>
    %180 = arith.mulf %177, %179 : vector<1x8x32xf32>
    %181 = vector.shape_cast %159 : vector<1x32xf32> to vector<1x1x32xf32>
    %182 = vector.broadcast %181 : vector<1x1x32xf32> to vector<1x8x32xf32>
    %183 = arith.addf %180, %182 : vector<1x8x32xf32>
    %c0_84 = arith.constant 0 : index
    %c0_85 = arith.constant 0 : index
    %c0_86 = arith.constant 0 : index
    %184 = vector.load %arg17[%c0_84, %c0_85, %c0_86] : memref<1x8x32xf32, #tpu.memory_space<vmem>>, vector<1x8x32xf32>
    tpu.vector_store %arg17[%c0_84, %c0_85, %c0_86], %183 {strides = array<i32>} : memref<1x8x32xf32, #tpu.memory_space<vmem>>, vector<1x8x32xf32>,
    %c1_i32 = arith.constant 1 : i32
    %185 = arith.cmpi eq, %arg1, %c1_i32 : i32
    %186 = arith.extui %185 : i1 to i32
    %c0_i32_87 = arith.constant 0 : i32
    %187 = arith.cmpi ne, %186, %c0_i32_87 : i32
    scf.if %187 {
      %c0_88 = arith.constant 0 : index
      %c0_89 = arith.constant 0 : index
      %c0_90 = arith.constant 0 : index
      %188 = vector.load %arg16[%c0_88, %c0_89, %c0_90] : memref<1x8x32xf32, #tpu.memory_space<vmem>>, vector<1x8x32xf32>
      tpu.vector_store %arg16[%c0_88, %c0_89, %c0_90], %183 {strides = array<i32>} : memref<1x8x32xf32, #tpu.memory_space<vmem>>, vector<1x8x32xf32>,
    } else {
    }
    return
  }
  func.func @transform_0(%arg0: i32, %arg1: i32) -> (i32, i32, i32) {
    %c0_i32 = arith.constant 0 : i32
    %c0_i32_0 = arith.constant 0 : i32
    %c0_i32_1 = arith.constant 0 : i32
    return %arg0, %c0_i32, %c0_i32_0 : i32, i32, i32
  }
  func.func @transform_1(%arg0: i32, %arg1: i32) -> (i32, i32, i32) {
    %c0_i32 = arith.constant 0 : i32
    %c0_i32_0 = arith.constant 0 : i32
    %c0_i32_1 = arith.constant 0 : i32
    return %arg0, %c0_i32, %c0_i32_0 : i32, i32, i32
  }
  func.func @transform_2(%arg0: i32, %arg1: i32) -> (i32, i32, i32) {
    %c0_i32 = arith.constant 0 : i32
    %c0_i32_0 = arith.constant 0 : i32
    %c0_i32_1 = arith.constant 0 : i32
    return %arg1, %c0_i32, %c0_i32_0 : i32, i32, i32
  }
  func.func @transform_3(%arg0: i32, %arg1: i32) -> (i32, i32, i32) {
    %c0_i32 = arith.constant 0 : i32
    %c0_i32_0 = arith.constant 0 : i32
    %c0_i32_1 = arith.constant 0 : i32
    return %arg1, %c0_i32, %c0_i32_0 : i32, i32, i32
  }
  func.func @transform_4(%arg0: i32, %arg1: i32) -> (i32, i32, i32) {
    %c0_i32 = arith.constant 0 : i32
    %c0_i32_0 = arith.constant 0 : i32
    %c0_i32_1 = arith.constant 0 : i32
    return %arg1, %c0_i32, %c0_i32_0 : i32, i32, i32
  }
  func.func @transform_5(%arg0: i32, %arg1: i32) -> (i32, i32, i32) {
    %c0_i32 = arith.constant 0 : i32
    %c0_i32_0 = arith.constant 0 : i32
    %c0_i32_1 = arith.constant 0 : i32
    return %arg1, %c0_i32, %c0_i32_0 : i32, i32, i32
  }
  func.func @transform_6(%arg0: i32, %arg1: i32) -> (i32, i32, i32) {
    %c0_i32 = arith.constant 0 : i32
    %c0_i32_0 = arith.constant 0 : i32
    %c0_i32_1 = arith.constant 0 : i32
    return %arg1, %c0_i32, %c0_i32_0 : i32, i32, i32
  }
  func.func @transform_7(%arg0: i32, %arg1: i32) -> (i32, i32, i32) {
    %c0_i32 = arith.constant 0 : i32
    %c0_i32_0 = arith.constant 0 : i32
    %c0_i32_1 = arith.constant 0 : i32
    return %arg1, %c0_i32, %c0_i32_0 : i32, i32, i32
  }
  func.func @transform_8(%arg0: i32, %arg1: i32) -> (i32, i32, i32) {
    %c0_i32 = arith.constant 0 : i32
    %c0_i32_0 = arith.constant 0 : i32
    %c0_i32_1 = arith.constant 0 : i32
    return %arg1, %c0_i32, %c0_i32_0 : i32, i32, i32
  }
  func.func @transform_9(%arg0: i32, %arg1: i32) -> (i32, i32, i32) {
    %c0_i32 = arith.constant 0 : i32
    %c0_i32_0 = arith.constant 0 : i32
    %c0_i32_1 = arith.constant 0 : i32
    return %arg1, %c0_i32, %c0_i32_0 : i32, i32, i32
  }
  func.func @transform_10(%arg0: i32, %arg1: i32) -> (i32, i32, i32) {
    %c0_i32 = arith.constant 0 : i32
    %c0_i32_0 = arith.constant 0 : i32
    %c0_i32_1 = arith.constant 0 : i32
    return %arg1, %c0_i32, %c0_i32_0 : i32, i32, i32
  }
  func.func @transform_11(%arg0: i32, %arg1: i32) -> (i32, i32, i32) {
    %c0_i32 = arith.constant 0 : i32
    %c0_i32_0 = arith.constant 0 : i32
    %c0_i32_1 = arith.constant 0 : i32
    return %arg1, %c0_i32, %c0_i32_0 : i32, i32, i32
  }
  func.func @transform_12(%arg0: i32, %arg1: i32) -> (i32, i32, i32) {
    %c0_i32 = arith.constant 0 : i32
    %c0_i32_0 = arith.constant 0 : i32
    %c0_i32_1 = arith.constant 0 : i32
    return %arg1, %c0_i32, %c0_i32_0 : i32, i32, i32
  }
  func.func @transform_13(%arg0: i32, %arg1: i32) -> (i32, i32, i32) {
    %c0_i32 = arith.constant 0 : i32
    %c0_i32_0 = arith.constant 0 : i32
    %c0_i32_1 = arith.constant 0 : i32
    return %arg1, %c0_i32, %c0_i32_0 : i32, i32, i32
  }
  func.func @transform_14(%arg0: i32, %arg1: i32) -> (i32, i32, i32) {
    %c0_i32 = arith.constant 0 : i32
    %c0_i32_0 = arith.constant 0 : i32
    %c0_i32_1 = arith.constant 0 : i32
    return %arg0, %c0_i32, %c0_i32_0 : i32, i32, i32
  }
}

</mosaic_0001>

<bundles_post_ra>
// kernel: tpu_custom_call.1
= control target key start
LH: loop header
LB: loop body
LE: loop exit
PB: predicated region body
PF: predicated region fallthrough
CT: control target
= control target key end

     0   :  { %s3026_s0 = inlined_call_operand.hbm [shape: f32[2,8,32], index: 0, kind: input, shape index: {}]   ;;  %s3027_s1 = inlined_call_operand.hbm [shape: f32[2,1,8], index: 1, kind: input, shape index: {}]   ;;  %s3028_s2 = inlined_call_operand.vmem [shape: f32[2,32,96], index: 2, kind: input, shape index: {}]   ;;  %s3029_s3 = inlined_call_operand.vmem [shape: f32[2,1,96], index: 3, kind: input, shape index: {}]   ;;  %s3030_s4 = inlined_call_operand.vmem [shape: f32[2,32,32], index: 4, kind: input, shape index: {}]   ;;  %s3031_s5 = inlined_call_operand.vmem [shape: f32[2,1,32], index: 5, kind: input, shape index: {}]   ;;  %s3032_s6 = inlined_call_operand.vmem [shape: f32[2,1,32], index: 6, kind: input, shape index: {}]   ;;  %s3033_s7 = inlined_call_operand.vmem [shape: f32[2,1,32], index: 7, kind: input, shape index: {}]   ;;  %s3034_s8 = inlined_call_operand.vmem [shape: f32[2,32,64], index: 8, kind: input, shape index: {}]   ;;  %s3035_s9 = inlined_call_operand.vmem [shape: f32[2,1,64], index: 9, kind: input, shape index: {}]   ;;  %s3036_s10 = inlined_call_operand.vmem [shape: f32[2,64,32], index: 10, kind: input, shape index: {}]   ;;  %s3037_s11 = inlined_call_operand.vmem [shape: f32[2,1,32], index: 11, kind: input, shape index: {}]   ;;  %s3038_s12 = inlined_call_operand.vmem [shape: f32[2,1,32], index: 12, kind: input, shape index: {}]   ;;  %s3039_s13 = inlined_call_operand.vmem [shape: f32[2,1,32], index: 13, kind: input, shape index: {}]   ;;  %s3040_s14 = inlined_call_operand.hbm [shape: f32[2,8,32], index: 14, kind: output, shape index: {}]  }
   0x1   :  { %3054 = sst [smem:[#allocation26_spill]] %s3026_s0 }
   0x2   :  { %3055 = sst [smem:[#allocation27_spill]] %s3027_s1 }
   0x3   :  { %3056 = sst [smem:[#allocation28_spill]] %s3028_s2 }
   0x4   :  { %3057 = sst [smem:[#allocation29_spill]] %s3030_s4 }
   0x5   :  { %3058 = sst [smem:[#allocation30_spill]] %s3033_s7 }
   0x6   :  { %3059 = sst [smem:[#allocation31_spill]] %s3034_s8 }
   0x7   :  { %3060 = sst [smem:[#allocation32_spill]] %s3038_s12 }
   0x8   :  { %3061 = sst [smem:[#allocation33_spill]] %s3039_s13 }
   0x9   :  { %3062 = sst [smem:[#allocation34_spill]] %s3040_s14 }
   0xa   :  { %19 = vsyncpa [#allocation5], 0 }
   0xb   :  { %21 = vsyncpa [#allocation5 + $0x1], 0 }
   0xc   :  { %22 = vsyncpa [#allocation8], 0 }
   0xd   :  { %24 = vsyncpa [#allocation8 + $0x1], 0 }
   0xe   :  { %25 = vsyncpa [#allocation6], 0 }
   0xf   :  { %27 = vsyncpa [#allocation6 + $0x1], 0  ;;  %s2618_s29 = smov 0   ;;  %s2620_s30 = smov 0  }
  0x10   :  { %s2622_s15 = smov 0   ;;  %s2624_s16 = smov 0  }
  0x11   :  { %s2626_s17 = smov 0   ;;  %s2628_s18 = smov 0  }
  0x12   :  { %s2630_s19 = smov 0   ;;  %s2632_s20 = smov 0  }
  0x13 LB: > { %3063 = sst [smem:[#allocation13_spill]] %s2494_s29  ;;  %s2062_s21 = sadd.s32 4294967295, %s2522_s20   ;;  %s2522_s20 = sphi %s2632_s20, %s33_s20   ;;  %s2518_s19 = sphi %s2630_s19, %s3111_s19   ;;  %s2514_s18 = sphi %s2628_s18, %s3110_s18   ;;  %s2510_s17 = sphi %s2626_s17, %s3109_s17   ;;  %s2506_s16 = sphi %s2624_s16, %s3108_s16   ;;  %s2502_s15 = sphi %s2622_s15, %s3107_s15   ;;  %s2498_s30 = sphi %s2620_s30, %s3106_s30   ;;  %s2494_s29 = sphi %s2618_s29, %s3105_s29  }
  0x14   : > { %3064 = sst [smem:[#allocation14_spill]] %s2498_s30  ;;  %s2063_s22 = sadd.s32 4294967294, %s2522_s20  }
  0x15   : > { %3065 = sst [smem:[#allocation15_spill]] %s2502_s15  ;;  %s42_s23 = sadd.s32 1, %s2514_s18 }
  0x16   : > { %3066 = sst [smem:[#allocation16_spill]] %s2510_s17  ;;  %s45_s24 = sadd.s32 1, %s2518_s19 }
  0x17   : > { %3067 = sst [smem:[#allocation17_spill]] %s2514_s18  ;;  %p43_p0 = scmp.ge.s32.totalorder %s42_s23, 2 }
  0x18   : > { %3068 = sst [smem:[#allocation18_spill]] %s2518_s19  ;;  %s52_s25 = sadd.s32 1, %s2502_s15 }
  0x19   : > { %3069 = sst [smem:[#allocation19_spill]] %s2522_s20  ;;  %p59_p1 = scmp.ne.s32.totalorder %s2502_s15, %s2498_s30 }
  0x1a   : > { %p60_p2 = scmp.eq.s32.totalorder %s2522_s20, 0  ;;  %s3113_s23 = smov (%p43_p0, %s42_s23), 0 }
  0x1b   : > { %3070 = sst [smem:[#allocation20_spill]] %s3113_s23  ;;  %s3115_s24 = smov (!%p43_p0, %s45_s24), %s2518_s19 }
  0x1c   : > { %p2669_p3 = por %p60_p2, %p59_p1  ;;  %p65_p4 = scmp.ne.s32.totalorder %s2498_s30, %s2494_s29 }
  0x1d   : > { %p47_p5 = scmp.ge.s32.totalorder %s3115_s24, 2  ;;  %p66_p6 = scmp.eq.s32.totalorder %s2062_s21, 0 }
  0x1e   : > { %p427_p7 = scmp.eq.s32.totalorder %s2062_s21, 3  ;;  %p433_p8 = scmp.eq.s32.totalorder %s2063_s22, 3 }
  0x1f   : > { %s3117_s24 = smov (%p47_p5, %s3115_s24), 0  ;;  %p2677_p9 = por %p66_p6, %p65_p4 }
  0x20   : > { %3072 = sst [smem:[#allocation21_spill]] %s3117_s24  ;;  %p2681_p10 = por %p427_p7, %p59_p1 }
  0x21   : > { %s49_s23 = ssub.s32 %s2518_s19, %s3117_s24  ;;  %p2687_p11 = por %p433_p8, %p65_p4 }
  0x22   : > { %s3074_s28 = scalar_select %p2681_p10, 1, 0 }
  0x23   : > { %s3076_s18 = scalar_select %p2687_p11, 1, 0 }
  0x24   : > { %3075 = sst [smem:[#allocation22_spill]] %s3074_s28  ;;  %p50_p12 = scmp.eq.s32.totalorder %s49_s23, 0 }
  0x25   : > { %3077 = sst [smem:[#allocation23_spill]] %s3076_s18  ;;  %p2264_p13 = scmp.lt.s32.totalorder %s2522_s20, 4 }
  0x26   : > { %s2693_s21 = sand.u32 1, %s2502_s15   ;;  %s2067_s14 = sshll.u32 %s2518_s19, 7 }
  0x27   : > { %s2696_s22 = scalar_select %p50_p12, %s2502_s15, %s52_s25  }
  0x28   : > { %s2066_s29 = sshll.u32 %s2693_s21, 3  ;;  %s3079_s0 = sld [smem:[#allocation26_spill]] }
  0x29   : > { %3078 = sst [smem:[#allocation24_spill]] %s2696_s22  ;;  %s457_s28 = scalar_lea.vmem [#allocation4], %s2066_s29 }
  0x2a   : > { %s464_s24 = sshll.u32 %s457_s28, 4  ;;  %p2705_p0 = pnand %p2264_p13, %p2669_p3  ;;  %s465_s24 = int_to_ptr.vmem [resolvable:$true] %s464_s24 }
  0x2b   : > { %p2069_p1 = scmp.ge.s32.totalorder %s2522_s20, 1  ;;  %p566_p2 = scmp.lt.s32.totalorder %s2522_s20, 5 }
  0x2c   : > { %s454_s23 = scalar_lea.sflag [#allocation5], %s2693_s21  ;;  %p2368_p4 = pneg %p2705_p0 }
  0x2d   : > { %s2379_s25 = scalar_lea.vmem %s465_s24, 128  ;;  %s2524_s13 = smov [#allocation4]  }
  0x2e   : > { %s462_s12 = scalar_lea.hbm %s3079_s0, %s2067_s14  ;;  %p2380_p5 = scmp.ne.s32.totalorder %s465_s24, %s2379_s25 }
  0x2f   : > { %s2384_s14 = sshll.u32 %s2524_s13, 4  ;;  %s2385_s14 = int_to_ptr.vmem [resolvable:$false] %s2384_s14 }
  0x30   : > { %p2382_p6 = pnand %p2380_p5, %p2368_p4  ;;  %s2386_s29 = scalar_lea.vmem %s2385_s14, 256 }
  0x31   : > { %p2387_p3 = scmp.lt.s32.totalorder %s465_s24, %s2385_s14  ;;  %p2388_p8 = scmp.lt.s32.totalorder %s2386_s29, %s2379_s25 }
  0x32   : > { %p2383_p7 = pneg %p2382_p6 }
  0x33   : > { %p2389_p12 = por %p2388_p8, %p2387_p3 }
  0x35   : > { %p2390_p13 = pnand %p2389_p12, %p2383_p7 }
  0x37   : > { %2393 = shalt.err (!%p2390_p13)
}
  0x38   : > { %2256 = dma.hbm_to_vmem [thread:$0]  (!%p2705_p0), %s462_s12, 128, %s465_s24, %s454_s23  }
  0x39   : > { %p2723_p5 = pnand %p2069_p1, %p566_p2  ;;  %s2068_s26 = sshll.u32 %s2518_s19, 4 }
  0x3a   : > { %s474_s28 = scalar_lea.vmem [#allocation7], %s2693_s21  ;;  %s3082_s1 = sld [smem:[#allocation27_spill]] }
  0x3b   : > { %s481_s25 = sshll.u32 %s474_s28, 4  ;;  %s472_s0 = scalar_lea.sflag [#allocation8], %s2693_s21  ;;  %s482_s25 = int_to_ptr.vmem [resolvable:$true] %s481_s25 }
  0x3c   : > { %s2407_s22 = scalar_lea.vmem %s482_s25, 16  ;;  %s2525_s12 = smov [#allocation7]  }
  0x3d   : > { %p2408_p6 = scmp.ne.s32.totalorder %s482_s25, %s2407_s22  ;;  %s2412_s24 = sshll.u32 %s2525_s12, 4  ;;  %s2413_s24 = int_to_ptr.vmem [resolvable:$false] %s2412_s24 }
  0x3e   : > { %s2414_s23 = scalar_lea.vmem %s2413_s24, 32  ;;  %p2415_p1 = scmp.lt.s32.totalorder %s482_s25, %s2413_s24 }
  0x3f   : > { %p2410_p7 = pnand %p2408_p6, %p2368_p4  ;;  %p2416_p2 = scmp.lt.s32.totalorder %s2414_s23, %s2407_s22 }
  0x40   : > { %s479_s29 = scalar_lea.hbm %s3082_s1, %s2068_s26 }
  0x41   : > { %p2411_p3 = pneg %p2410_p7  ;;  %p2417_p8 = por %p2416_p2, %p2415_p1 }
  0x43   : > { %p2418_p12 = pnand %p2417_p8, %p2411_p3 }
  0x45   : > { %2421 = shalt.err (!%p2418_p12)
}
  0x46   : > { %2259 = dma.hbm_to_vmem [thread:$0]  (!%p2705_p0), %s479_s29, 16, %s482_s25, %s472_s0  }
  0x47   : > { %570 = sbr.rel (%p2723_p5) target bundleno = 2536 (0x9e8), region = 76 }
  0x4c   : > { %s2741_s21 = sand.u32 1, %s2498_s30  }
  0x4d   : > { %s2070_s26 = sshll.u32 %s2741_s21, 3  ;;  %s573_s28 = scalar_lea.sflag [#allocation5], %s2741_s21 }
  0x4e   : > { %s576_s13 = scalar_lea.vmem [#allocation4], %s2070_s26 }
  0x4f   : > { %2481 = dma.done.wait (%p2677_p9), %s573_s28, 128  }
  0x50   : > { %2483 = vsyncadd (%p2677_p9), %s573_s28, 4294967168  ;;  %s582_s0 = scalar_lea.sflag [#allocation8], %s2741_s21 }
  0x51   : > { %2485 = dma.done.wait (%p2677_p9), %s582_s0, 16  }
  0x52   : > { %2487 = vsyncadd (%p2677_p9), %s582_s0, 4294967280  ;;  %p677_p0 = scmp.lt.s32.totalorder %s2506_s16, 1  ;;  %s3083_s2 = sld [smem:[#allocation28_spill]] }
  0x53   : > { %s3084_s4 = sld [smem:[#allocation29_spill]]  ;;  %s2813_s23 = scalar_lea.vmem [#allocation9], %s2070_s26 }
  0x54   : > { %s2757_s22 = scalar_select %p677_p0, %s2506_s16, 1 }
  0x55   : > { %s3087_s8 = sld [smem:[#allocation31_spill]]  ;;  %p2080_p9 = scmp.ne.s32.totalorder %s2506_s16, 0 }
  0x56   : > { %s2111_s17 = sshll.u32 %s2757_s22, 5  ;;  %s714_s25 = scalar_lea.vmem %s3037_s11, %s2757_s22 }
  0x57   : > { %s3088_s20 = sld [smem:[#allocation32_spill]] }
  0x58   : > { %s2767_s24 = scalar_lea.vmem %s3083_s2, %s2111_s17 }
  0x59   : > { %s2772_s0 = scalar_lea.vmem %s3084_s4, %s2111_s17  ;;  %s706_s4 = scalar_lea.vmem %s3035_s9, %s2757_s22 }
  0x5a   : > { %3085 = sst [smem:[#allocation25_spill]] %s2772_s0  ;;  %s2114_s0 = sshll.u32 %s2757_s22, 6 }
  0x5b   : > { %s2789_s2 = scalar_lea.vmem %s3087_s8, %s2111_s17  ;;  %s2799_s19 = scalar_lea.vmem %s3036_s10, %s2114_s0 }
  0x5c   : > { %s3089_s8 = sld [smem:[#allocation33_spill]] }
  0x5d   : > { %s717_s29 = scalar_lea.vmem %s3088_s20, %s2757_s22 }
  0x5e   : > { %724 = sbr.rel (%p2080_p9) target bundleno = 101 (0x65), region = 88 }
  0x62   : > { %s720_s7 = scalar_lea.vmem %s3089_s8, %s2757_s22 }
  0x63   : > { %v725_v0 = vld [vmem:[%s576_s13] sm:$0xff]  ;;  %vm726_vm0 = vcmask 261120  }
  0x64   : > { %727 = vst.msk [vmem:[#allocation2] sm:$0xff] %vm726_vm0, %v725_v0 }
  0x65 PF: > { %v732_v1 = vld [vmem:[%s2767_s24 + $0x18] sm:$0xff]  ;;  %v2526_v2 = vmov 0.0   ;;  %v731_v3 = vld [vmem:[%s2767_s24 + $0x10] sm:$0xff]  ;;  %vm2527_vm1 = vmmov 0   ;;  %v730_v4 = vld [vmem:[%s2767_s24 + $0x8] sm:$0xff]  ;;  %vm740_vm2 = vcmask 261120   ;;  %s3090_s26 = scalar_lea.vmem %s3029_s3, %s2757_s22 }
  0x66   : > { %2155 = vmatprep.subr.mxu1 %v2526_v2  ;;  %2163 = vmatprep.mubr.msk.f32.mxu1 %vm2527_vm1, %v2526_v2  ;;  %v729_v5 = vld [vmem:[%s2767_s24] sm:$0xff]  ;;  %s2528_s13 = smov 120   ;;  %s2529_s27 = smov 96   ;;  %vm824_vm3 = vcmask 64512   ;;  %vm1156_vm4 = vcmask 130112   ;;  %vm1327_vm5 = vcmask 195712  }
  0x67   : > { %2156 = vmatpush3.msra.mxu1 %v732_v1  ;;  %2176 = vmatprep.subr.mxu0 %v2526_v2  ;;  %v2081_v7 = vld [vmem:[%s3090_s26] ss:$0 sm:$0xff]  ;;  %s2530_s24 = smov 80   ;;  %s2531_s0 = smov 88   ;;  %vm1498_vm6 = vcmask 261312   ;;  %vm1717_vm7 = vcmask 523264  }
  0x68   : > { %2157 = vmatprep.subr.mxu1 %v2526_v2  ;;  %2178 = vmatprep.mubr.msk.f32.mxu0 %vm2527_vm1, %v2526_v2  ;;  %s2532_s28 = smov 72   ;;  %s2533_s1 = smov 112  }
  0x69   : > { %2158 = vmatpush3.msra.mxu1 %v731_v3  ;;  %s2534_s18 = smov 104   ;;  %s3091_s30 = scalar_lea.vmem [#allocation7], %s2741_s21 }
  0x6a   : > { %2159 = vmatprep.subr.mxu1 %v2526_v2  ;;  %v2083_v18 = vld [vmem:[%s3091_s30] ss:$0 sm:$0xff]  ;;  %s2535_s15 = smov 56   ;;  %s2536_s14 = smov 64  }
  0x6b   : > { %2160 = vmatpush3.msra.mxu1 %v730_v4  ;;  %v2828_v6 = vld [vmem:[#allocation2] sm:$0xff]  ;;  %s2537_s17 = smov 48   ;;  %s2538_s12 = smov 40  }
  0x6c   : > { %2161 = vmatprep.subr.mxu1 %v2526_v2  ;;  %s3092_s8 = sld [smem:[#allocation25_spill]]  ;;  %s2539_s20 = smov 8  }
  0x6d   : > { %2162 = vmatpush3.msra.mxu1 %v729_v5  ;;  %s2540_s26 = smov 16   ;;  %p2106_p4 = scmp.ne.s32.totalorder %s2506_s16, 1 }
  0x6e   : > { %2164 = vmatmul.mubr.msk.f32.vlgmr.msra.gmra.mxu1 %vm740_vm2, %v2828_v6  ;;  %2166 = vmatprep.subr.mxu1 %v2526_v2 }
  0x6f   : > { %2168 = vmatprep.mubr.msk.f32.mxu1 %vm2527_vm1, %v2526_v2 }
 0x12e   : > { %v810_v8 = vpop.f32.mrf.mxu1 }
 0x12f   : > { %v2841_v9 = vadd.f32 %v2081_v7, %v810_v8 }
 0x130   : > { %v2165_v10 = vpop.f32.mrf.mxu1 }
 0x131   : > { %987 = vrot.lane.b32.xlu1 %v2841_v9, %s2528_s13  ;;  %822 = vrot.lane.b32.xlu0 %v2841_v9, %s2529_s27  ;;  %s2541_s13 = smov 24  }
 0x135   : > { %1160 = vrot.lane.b32.xlu1 %v2841_v9, %s2530_s24  ;;  %989 = vrot.lane.b32.xlu0 %v2841_v9, %s2531_s0  ;;  %s3093_s0 = scalar_lea.vmem %s3031_s5, %s2757_s22 }
 0x139   : > { %1331 = vrot.lane.b32.xlu1 %v2841_v9, %s2532_s28  ;;  %1158 = vrot.lane.b32.xlu0 %v2841_v9, %s2533_s1  ;;  %s3094_s1 = scalar_lea.vmem %s3032_s6, %s2757_s22 }
 0x13d   : > { %1329 = vrot.lane.b32.xlu0 %v2841_v9, %s2534_s18 }
 0x1a3   : > { %v988_v11 = vpop.permute.xlu1 %987  ;;  %v823_v12 = vpop.permute.xlu0 %822 }
 0x1a4   : > { %2167 = vmatpush3.xpose.msk.msra.mxu1 %vm824_vm3, %v823_v12 }
 0x1a5   : > { %2171 = vmatprep.subr.mxu1 %v2526_v2 }
 0x1a7   : > { %2169 = vmatmul.mubr.msk.f32.vlgmr.msra.gmra.mxu1 %vm824_vm3, %v2841_v9  ;;  %v990_v13 = vpop.permute.xlu0 %989  ;;  %v1161_v14 = vpop.permute.xlu1 %1160 }
 0x1a8   : > { %2177 = vmatpush3.xpose.msk.msra.mxu0 %vm824_vm3, %v990_v13  ;;  %2173 = vmatprep.mubr.msk.f32.mxu1 %vm2527_vm1, %v2526_v2  ;;  %v1504_v13 = vld [vmem:[%s3092_s8 + $0x18] sm:$0xff] }
 0x1a9   : > { %2186 = vmatprep.subr.mxu0 %v2526_v2 }
 0x1ab   : > { %2179 = vmatmul.mubr.msk.f32.vlgmr.msra.gmra.mxu0 %vm824_vm3, %v988_v11  ;;  %v1159_v15 = vpop.permute.xlu0 %1158  ;;  %v1332_v16 = vpop.permute.xlu1 %1331 }
 0x1ac   : > { %2187 = vmatpush3.xpose.msk.msra.mxu0 %vm824_vm3, %v1161_v14  ;;  %2188 = vmatprep.mubr.msk.f32.mxu0 %vm2527_vm1, %v2526_v2  ;;  %v1503_v14 = vld [vmem:[%s3092_s8 + $0x10] sm:$0xff] }
 0x1ad   : > { %2196 = vmatprep.subr.mxu0 %v2526_v2 }
 0x1af   : > { %2189 = vmatmul.mubr.msk.f32.vlgmr.msra.gmra.mxu0 %vm824_vm3, %v1159_v15  ;;  %v1330_v17 = vpop.permute.xlu0 %1329  ;;  %v1502_v15 = vld [vmem:[%s3092_s8 + $0x8] sm:$0xff] }
 0x1b0   : > { %2197 = vmatpush3.xpose.msk.msra.mxu0 %vm824_vm3, %v1332_v16  ;;  %2198 = vmatprep.mubr.msk.f32.mxu0 %vm2527_vm1, %v2526_v2  ;;  %v1501_v16 = vld [vmem:[%s3092_s8] sm:$0xff] }
 0x1b1   : > { %2206 = vmatprep.subr.mxu0 %v2526_v2 }
 0x1b3   : > { %2199 = vmatmul.mubr.msk.f32.vlgmr.msra.gmra.mxu0 %vm824_vm3, %v1330_v17 }
 0x1b4   : > { %2214 = vmatprep.mubr.msk.f32.mxu0 %vm2527_vm1, %v2526_v2  ;;  %2207 = vmatpush3.msra.mxu0 %v1504_v13  ;;  %v2104_v13 = vld [vmem:[%s717_s29] ss:$0 sm:$0xff] }
 0x1b5   : > { %2208 = vmatprep.subr.mxu0 %v2526_v2 }
 0x1b6   : > { %2209 = vmatpush3.msra.mxu0 %v1503_v14 }
 0x1b7   : > { %2210 = vmatprep.subr.mxu0 %v2526_v2 }
 0x1b8   : > { %2211 = vmatpush3.msra.mxu0 %v1502_v15  ;;  %v2105_v15 = vld [vmem:[%s720_s7] ss:$0 sm:$0xff] }
 0x1b9   : > { %2212 = vmatprep.subr.mxu0 %v2526_v2 }
 0x1ba   : > { %2213 = vmatpush3.msra.mxu0 %v1501_v16 }
 0x1bb   : > { %2228 = vmatprep.subr.mxu0 %v2526_v2 }
 0x267   : > { %v895_v19 = vpop.f32.mrf.mxu1 }
 0x268   : > { %v896_v20 = vadd.f32 %v2083_v18, %v895_v19 }
 0x269   : > { %v2170_v21 = vpop.f32.mrf.mxu1 }
 0x26a   : > { %v899_v22 = vsel %vm824_vm3, %v896_v20, -inf }
 0x26b   : > { %v1061_v23 = vpop.f32.mrf.mxu0  ;;  %900 = vmax.xlane.f32.xlu1 %v899_v22 }
 0x26c   : > { %v1062_v24 = vadd.f32 %v2083_v18, %v1061_v23 }
 0x26d   : > { %v2180_v25 = vpop.f32.mrf.mxu0 }
 0x26e   : > { %v1065_v26 = vsel %vm824_vm3, %v1062_v24, -inf  ;;  %v2097_v25 = vld [vmem:[%s3093_s0] ss:$0 sm:$0xff] }
 0x26f   : > { %1066 = vmax.xlane.f32.xlu0 %v1065_v26  ;;  %v1232_v27 = vpop.f32.mrf.mxu0 }
 0x270   : > { %v1233_v28 = vadd.f32 %v2083_v18, %v1232_v27 }
 0x271   : > { %v2190_v29 = vpop.f32.mrf.mxu0 }
 0x272   : > { %v1236_v30 = vsel %vm824_vm3, %v1233_v28, -inf }
 0x273   : > { %1237 = vmax.xlane.f32.xlu0 %v1236_v30  ;;  %v1403_v31 = vpop.f32.mrf.mxu0 }
 0x274   : > { %v1404_v32 = vadd.f32 %v2083_v18, %v1403_v31 }
 0x275   : > { %v2200_v33 = vpop.f32.mrf.mxu0 }
 0x276   : > { %v1407_v34 = vsel %vm824_vm3, %v1404_v32, -inf }
 0x277   : > { %1408 = vmax.xlane.f32.xlu1 %v1407_v34 }
 0x288   : > { %1076 = vrot.lane.b32.xlu1 %v2841_v9, %s2535_s15  ;;  %s3095_s15 = sld [smem:[#allocation30_spill]] }
 0x2f4   : > { %v901_v35 = vpop.xlane.xlu1 %900 }
 0x2f5   : > { %v902_v36 = vsub.f32 %v896_v20, %v901_v35 }
 0x2f7   : > { %v903_v37 = vmul.f32 1.442695, %v902_v36  ;;  %v1620_v36 = vld [vmem:[%s2789_s2 + $0x18] sm:$0xff] }
 0x2f8   : > { %v1067_v38 = vpop.xlane.xlu0 %1066 }
 0x2f9   : > { %2346 = vpow2.f32 %v903_v37  ;;  %v1068_v39 = vsub.f32 %v1062_v24, %v1067_v38  ;;  %v1619_v37 = vld [vmem:[%s2789_s2 + $0x10] sm:$0xff]  ;;  %v1617_v38 = vld [vmem:[%s2789_s2] sm:$0xff] }
 0x2fb   : > { %v1069_v40 = vmul.f32 1.442695, %v1068_v39  ;;  %v1709_v39 = vld [vmem:[%s2799_s19 + $0x38] sm:$0xff] }
 0x2fc   : > { %v1238_v50 = vpop.xlane.xlu0 %1237 }
 0x2fd   : > { %2348 = vpow2.f32 %v1069_v40  ;;  %v1239_v51 = vsub.f32 %v1233_v28, %v1238_v50  ;;  %v1708_v40 = vld [vmem:[%s2799_s19 + $0x30] sm:$0xff] }
 0x2ff   : > { %v1240_v52 = vmul.f32 1.442695, %v1239_v51 }
 0x300   : > { %v1409_v41 = vpop.xlane.xlu1 %1408 }
 0x301   : > { %v1410_v42 = vsub.f32 %v1404_v32, %v1409_v41  ;;  %v1707_v41 = vld [vmem:[%s2799_s19 + $0x28] sm:$0xff] }
 0x303   : > { %v1411_v43 = vmul.f32 1.442695, %v1410_v42  ;;  %v1706_v42 = vld [vmem:[%s2799_s19 + $0x20] sm:$0xff] }
 0x304   : > { %v1077_v55 = vpop.permute.xlu1 %1076 }
 0x305   : > { %2350 = vpow2.f32 %v1411_v43  ;;  %v1705_v43 = vld [vmem:[%s2799_s19 + $0x18] sm:$0xff] }
 0x306   : > { %v2347_v44 = vpop.eup %2346  ;;  %2352 = vpow2.f32 %v1240_v52 }
 0x307   : > { %v905_v45 = vsel %vm824_vm3, %v2347_v44, 0.0 }
 0x308   : > { %906 = vadd.xlane.f32.xlu0 %v905_v45 }
 0x30a   : > { %v2349_v46 = vpop.eup %2348 }
 0x30b   : > { %v1071_v47 = vsel %vm824_vm3, %v2349_v46, 0.0 }
 0x30c   : > { %1072 = vadd.xlane.f32.xlu1 %v1071_v47 }
 0x312   : > { %v2351_v48 = vpop.eup %2350 }
 0x313   : > { %v1413_v49 = vsel %vm824_vm3, %v2351_v48, 0.0  ;;  %v2353_v53 = vpop.eup %2352 }
 0x314   : > { %1414 = vadd.xlane.f32.xlu1 %v1413_v49  ;;  %v1242_v54 = vsel %vm824_vm3, %v2353_v53, 0.0 }
 0x31e   : > { %910 = vrot.lane.b32.xlu0 %v2841_v9, %s2536_s14  ;;  %s3096_s14 = scalar_lea.vmem %s3095_s15, %s2757_s22 }
 0x31f   : > { %v2099_v50 = vld [vmem:[%s3096_s14] ss:$0 sm:$0xff] }
 0x325   : > { %1247 = vrot.lane.b32.xlu1 %v2841_v9, %s2537_s17 }
 0x33d   : > { %1243 = vadd.xlane.f32.xlu0 %v1242_v54  ;;  %v1703_v54 = vld [vmem:[%s2799_s19 + $0x8] sm:$0xff] }
 0x353   : > { %1418 = vrot.lane.b32.xlu0 %v2841_v9, %s2538_s12 }
 0x391   : > { %v907_v56 = vpop.xlane.xlu0 %906 }
 0x392   : > { %2354 = vrcp.f32 %v907_v56  ;;  %v2100_v56 = vld [vmem:[%s706_s4] ss:$0 sm:$0xff] }
 0x395   : > { %v911_v57 = vpop.permute.xlu0 %910  ;;  %v1073_v58 = vpop.xlane.xlu1 %1072 }
 0x396   : > { %2356 = vrcp.f32 %v1073_v58  ;;  %2172 = vmatpush3.msra.mxu1 %v911_v57 }
 0x397   : > { %2181 = vmatprep.subr.mxu1 %v2526_v2 }
 0x39d   : > { %v1415_v60 = vpop.xlane.xlu1 %1414 }
 0x39f   : > { %v2355_v59 = vpop.eup %2354 }
 0x3a0   : > { %v909_v61 = vmul.f32 %v2355_v59, %v2347_v44 }
 0x3a1   : > { %v1248_v0 = vpop.permute.xlu1 %1247 }
 0x3a2   : > { %2174 = vmatmul.mubr.msk.f32.vlgmr.msra.gmra.mxu1 %vm824_vm3, %v909_v61  ;;  %v2102_v61 = vld [vmem:[%s714_s25] ss:$0 sm:$0xff] }
 0x3a3   : > { %v2357_v62 = vpop.eup %2356  ;;  %2182 = vmatpush3.msra.mxu1 %v1077_v55  ;;  %2183 = vmatprep.mubr.msk.f32.mxu1 %vm2527_vm1, %v2526_v2  ;;  %v1702_v55 = vld [vmem:[%s2799_s19] sm:$0xff] }
 0x3a4   : > { %2191 = vmatprep.subr.mxu1 %v2526_v2  ;;  %v1075_v63 = vmul.f32 %v2357_v62, %v2349_v46 }
 0x3a6   : > { %2184 = vmatmul.mubr.msk.f32.vlgmr.msra.gmra.mxu1 %vm824_vm3, %v1075_v63 }
 0x3a7   : > { %2192 = vmatpush3.msra.mxu1 %v1248_v0  ;;  %2193 = vmatprep.mubr.msk.f32.mxu1 %vm2527_vm1, %v2526_v2 }
 0x3a8   : > { %2201 = vmatprep.subr.mxu1 %v2526_v2 }
 0x3c6   : > { %v1244_v1 = vpop.xlane.xlu0 %1243 }
 0x3c7   : > { %2358 = vrcp.f32 %v1244_v1 }
 0x3c8   : > { %2360 = vrcp.f32 %v1415_v60 }
 0x3ca   : > { %v1419_v7 = vpop.permute.xlu0 %1418 }
 0x3d4   : > { %v2359_v3 = vpop.eup %2358 }
 0x3d5   : > { %v1246_v4 = vmul.f32 %v2359_v3, %v2353_v53  ;;  %v2361_v5 = vpop.eup %2360  ;;  %v1704_v53 = vld [vmem:[%s2799_s19 + $0x10] sm:$0xff] }
 0x3d6   : > { %v1417_v8 = vmul.f32 %v2361_v5, %v2351_v48  ;;  %v2098_v48 = vld [vmem:[%s3094_s1] ss:$0 sm:$0xff] }
 0x3d7   : > { %2194 = vmatmul.mubr.msk.f32.vlgmr.msra.gmra.mxu1 %vm824_vm3, %v1246_v4 }
 0x3d8   : > { %2202 = vmatpush3.msra.mxu1 %v1419_v7  ;;  %2203 = vmatprep.mubr.msk.f32.mxu1 %vm2527_vm1, %v2526_v2 }
 0x3d9   : > { %2217 = vmatprep.subr.mxu1 %v2526_v2 }
 0x3db   : > { %2204 = vmatmul.mubr.msk.f32.vlgmr.msra.gmra.mxu1 %vm824_vm3, %v1417_v8 }
 0x3dc   : > { %2225 = vmatprep.mubr.msk.f32.mxu1 %vm2527_vm1, %v2526_v2  ;;  %2218 = vmatpush3.msra.mxu1 %v1620_v36 }
 0x3dd   : > { %2219 = vmatprep.subr.mxu1 %v2526_v2 }
 0x3de   : > { %2220 = vmatpush3.msra.mxu1 %v1619_v37 }
 0x3df   : > { %2221 = vmatprep.subr.mxu1 %v2526_v2 }
 0x462   : > { %v982_v9 = vpop.f32.mrf.mxu1 }
 0x463   : > { %986 = vst.msk [vmem:[#allocation3] sm:$0xff] %vm824_vm3, %v982_v9 }
 0x464   : > { %v2175_v10 = vpop.f32.mrf.mxu1 }
 0x466   : > { %v1148_v11 = vpop.f32.mrf.mxu1 }
 0x467   : > { %1153 = vrot.lane.b32.xlu1 %v1148_v11, %s2539_s20 }
 0x468   : > { %v2185_v12 = vpop.f32.mrf.mxu1 }
 0x497   : > { %v1319_v17 = vpop.f32.mrf.mxu1 }
 0x498   : > { %1324 = vrot.lane.b32.xlu0 %v1319_v17, %s2540_s26 }
 0x499   : > { %v2195_v18 = vpop.f32.mrf.mxu1 }
 0x49b   : > { %v1490_v19 = vpop.f32.mrf.mxu1 }
 0x49c   : > { %1495 = vrot.lane.b32.xlu1 %v1490_v19, %s2541_s13 }
 0x49d   : > { %v2205_v20 = vpop.f32.mrf.mxu1 }
 0x4d9   : > { %v1154_v21 = vpop.permute.xlu1 %1153 }
 0x4da   : > { %1157 = vst.msk [vmem:[#allocation3] sm:$0xff] %vm1156_vm4, %v1154_v21 }
 0x50a   : > { %v1325_v22 = vpop.permute.xlu0 %1324 }
 0x50b   : > { %1328 = vst.msk [vmem:[#allocation3] sm:$0xff] %vm1327_vm5, %v1325_v22 }
 0x50e   : > { %v1496_v23 = vpop.permute.xlu1 %1495 }
 0x50f   : > { %1499 = vst.msk [vmem:[#allocation3] sm:$0xff] %vm1498_vm6, %v1496_v23 }
 0x516   : > { %v1500_v24 = vld [vmem:[#allocation3] sm:$0xff] }
 0x517   : > { %2215 = vmatmul.mubr.msk.f32.vlgmr.msra.gmra.mxu0 %vm740_vm2, %v1500_v24 }
 0x518   : > { %2244 = vmatprep.mubr.msk.f32.mxu0 %vm2527_vm1, %v2526_v2  ;;  %2229 = vmatpush3.msra.mxu0 %v1709_v39 }
 0x519   : > { %2230 = vmatprep.subr.mxu0 %v2526_v2 }
 0x51a   : > { %2231 = vmatpush3.msra.mxu0 %v1708_v40 }
 0x51b   : > { %2232 = vmatprep.subr.mxu0 %v2526_v2 }
 0x51c   : > { %2233 = vmatpush3.msra.mxu0 %v1707_v41 }
 0x51d   : > { %2234 = vmatprep.subr.mxu0 %v2526_v2 }
 0x51e   : > { %2235 = vmatpush3.msra.mxu0 %v1706_v42 }
 0x51f   : > { %2236 = vmatprep.subr.mxu0 %v2526_v2 }
 0x520   : > { %2237 = vmatpush3.msra.mxu0 %v1705_v43 }
 0x521   : > { %2238 = vmatprep.subr.mxu0 %v2526_v2 }
 0x522   : > { %2239 = vmatpush3.msra.mxu0 %v1704_v53 }
 0x523   : > { %2240 = vmatprep.subr.mxu0 %v2526_v2 }
 0x524   : > { %2241 = vmatpush3.msra.mxu0 %v1703_v54 }
 0x525   : > { %2242 = vmatprep.subr.mxu0 %v2526_v2 }
 0x526   : > { %2243 = vmatpush3.msra.mxu0 %v1702_v55 }
 0x5d7   : > { %v1574_v26 = vpop.f32.mrf.mxu0 }
 0x5d8   : > { %v1585_v27 = vadd.f32 %v2097_v25, %v1574_v26 }
 0x5d9   : > { %v2216_v28 = vpop.f32.mrf.mxu0 }
 0x5da   : > { %v1586_v29 = vadd.f32 %v1585_v27, %v2828_v6  ;;  %v1618_v6 = vld [vmem:[%s2789_s2 + $0x8] sm:$0xff] }
 0x5db   : > { %2222 = vmatpush3.msra.mxu1 %v1618_v6 }
 0x5dc   : > { %v1589_v30 = vsel %vm740_vm2, %v1586_v29, 0.0  ;;  %2223 = vmatprep.subr.mxu1 %v2526_v2 }
 0x5dd   : > { %1590 = vadd.xlane.f32.xlu0 %v1589_v30  ;;  %2224 = vmatpush3.msra.mxu1 %v1617_v38 }
 0x666   : > { %v1591_v31 = vpop.xlane.xlu0 %1590 }
 0x667   : > { %v1593_v32 = vmul.f32 0.03125, %v1591_v31 }
 0x669   : > { %v1594_v33 = vsub.f32 %v1586_v29, %v1593_v32 }
 0x66b   : > { %v1595_v34 = vmul.f32 %v1594_v33, %v1594_v33 }
 0x66d   : > { %v1596_v35 = vsel %vm740_vm2, %v1595_v34, 0.0 }
 0x66e   : > { %1597 = vadd.xlane.f32.xlu1 %v1596_v35 }
 0x6f7   : > { %v1598_v44 = vpop.xlane.xlu1 %1597 }
 0x6f8   : > { %v1599_v45 = vmul.f32 0.03125, %v1598_v44 }
 0x6fa   : > { %v1600_v46 = vadd.f32 1e-05, %v1599_v45 }
 0x6fc   : > { %2362 = vrsqrt.f32 %v1600_v46 }
 0x709   : > { %v2363_v47 = vpop.eup %2362 }
 0x70a   : > { %v1602_v49 = vmul.f32 %v2363_v47, %v1594_v33 }
 0x70c   : > { %v1609_v51 = vmul.f32 %v2098_v48, %v1602_v49 }
 0x70e   : > { %v1616_v52 = vadd.f32 %v2099_v50, %v1609_v51 }
 0x710   : > { %2226 = vmatmul.mubr.msk.f32.vlgmr.msra.gmra.mxu1 %vm740_vm2, %v1616_v52 }
 0x7d0   : > { %v1697_v57 = vpop.f32.mrf.mxu1 }
 0x7d1   : > { %v1698_v58 = vadd.f32 %v2100_v56, %v1697_v57 }
 0x7d2   : > { %v2227_v59 = vpop.f32.mrf.mxu1 }
 0x7d3   : > { %v1701_v60 = vmax.f32 %v1698_v58, 0.0 }
 0x7d5   : > { %2245 = vmatmul.mubr.msk.f32.vlgmr.msra.gmra.mxu0 %vm1717_vm7, %v1701_v60 }
 0x895   : > { %v1787_v62 = vpop.f32.mrf.mxu0 }
 0x896   : > { %v1788_v63 = vadd.f32 %v2102_v61, %v1787_v62 }
 0x897   : > { %v2246_v2 = vpop.f32.mrf.mxu0 }
 0x898   : > { %v1791_v0 = vadd.f32 %v1788_v63, %v1616_v52 }
 0x89a   : > { %v1794_v1 = vsel %vm740_vm2, %v1791_v0, 0.0 }
 0x89b   : > { %1795 = vadd.xlane.f32.xlu0 %v1794_v1 }
 0x924   : > { %v1796_v3 = vpop.xlane.xlu0 %1795 }
 0x925   : > { %v1797_v4 = vmul.f32 0.03125, %v1796_v3 }
 0x927   : > { %v1798_v5 = vsub.f32 %v1791_v0, %v1797_v4 }
 0x929   : > { %v1799_v7 = vmul.f32 %v1798_v5, %v1798_v5 }
 0x92b   : > { %v1800_v8 = vsel %vm740_vm2, %v1799_v7, 0.0 }
 0x92c   : > { %1801 = vadd.xlane.f32.xlu0 %v1800_v8 }
 0x9b5   : > { %v1802_v9 = vpop.xlane.xlu0 %1801 }
 0x9b6   : > { %v1803_v10 = vmul.f32 0.03125, %v1802_v9 }
 0x9b8   : > { %v1804_v11 = vadd.f32 1e-05, %v1803_v10 }
 0x9ba   : > { %2364 = vrsqrt.f32 %v1804_v11 }
 0x9c7   : > { %v2365_v12 = vpop.eup %2364 }
 0x9c8   : > { %v1806_v14 = vmul.f32 %v2365_v12, %v1798_v5 }
 0x9ca   : > { %v1813_v16 = vmul.f32 %v2104_v13, %v1806_v14  ;;  %1825 = sbr.rel (%p2106_p4) target bundleno = 2512 (0x9d0), region = 92 }
 0x9cc   : > { %v1820_v17 = vadd.f32 %v2105_v15, %v1813_v16 }
 0x9ce   : > { %1821 = vst.msk [vmem:[#allocation2] sm:$0xff] %vm740_vm2, %v1820_v17 }
 0x9cf   : > { %1826 = vst.msk [vmem:[%s2813_s23] sm:$0xff] %vm740_vm2, %v1820_v17 }
 0x9d0 PF: > { %s3099_s24 = sld [smem:[#allocation16_spill]]  ;;  %s1841_s1 = sshll.u32 %s2813_s23, 4  ;;  %s1842_s1 = int_to_ptr.vmem [resolvable:$true] %s1841_s1 }
 0x9d1   : > { %s3101_s22 = sld [smem:[#allocation34_spill]]  ;;  %s1828_s18 = scalar_lea.sflag [#allocation6], %s2741_s21 }
 0x9d2   : > { %s2422_s30 = scalar_lea.vmem %s1842_s1, 128  ;;  %s2542_s16 = smov [#allocation9]  }
 0x9d3   : > { %p2423_p13 = scmp.ne.s32.totalorder %s1842_s1, %s2422_s30  ;;  %s2426_s15 = sshll.u32 %s2542_s16, 4  ;;  %s2427_s15 = int_to_ptr.vmem [resolvable:$false] %s2426_s15 }
 0x9d4   : > { %s2428_s14 = scalar_lea.vmem %s2427_s15, 256  ;;  %p2429_p7 = scmp.lt.s32.totalorder %s1842_s1, %s2427_s15 }
 0x9d5   : > { %p2424_p5 = pnand %p2423_p13, %p2681_p10  ;;  %p2430_p3 = scmp.lt.s32.totalorder %s2428_s14, %s2422_s30 }
 0x9d6   : > { %s2108_s0 = sshll.u32 %s3099_s24, 7 }
 0x9d7   : > { %s1839_s7 = scalar_lea.hbm %s3101_s22, %s2108_s0  ;;  %p2425_p6 = pneg %p2424_p5 }
 0x9d8   : > { %p2431_p1 = por %p2430_p3, %p2429_p7 }
 0x9da   : > { %p2432_p2 = pnand %p2431_p1, %p2425_p6 }
 0x9dc   : > { %2435 = shalt.err (!%p2432_p2)
}
 0x9dd   : > { %s2436_s17 = scalar_lea.hbm %s1839_s7, 128  ;;  %s2440_s12 = scalar_lea.hbm %s3101_s22, 256 }
 0x9de   : > { %p2437_p8 = scmp.ne.s32.totalorder %s1839_s7, %s2436_s17  ;;  %p2441_p9 = scmp.lt.s32.totalorder %s1839_s7, %s3101_s22 }
 0x9df   : > { %p2442_p4 = scmp.lt.s32.totalorder %s2440_s12, %s2436_s17 }
 0x9e0   : > { %p2438_p12 = pnand %p2437_p8, %p2681_p10 }
 0x9e1   : > { %p2443_p13 = por %p2442_p4, %p2441_p9 }
 0x9e2   : > { %p2439_p0 = pneg %p2438_p12 }
 0x9e4   : > { %p2444_p5 = pnand %p2443_p13, %p2439_p0 }
 0x9e6   : > { %2447 = shalt.err (!%p2444_p5)
}
 0x9e7   : > { %2251 = dma.vmem_to_hbm [thread:$0]  (%p2681_p10), %s1842_s1, 128, %s1839_s7, %s1828_s18  }
 0x9e8 PF: > { %s3102_s4 = sld [smem:[#allocation19_spill]] }
 0x9e9   : > { %s3103_s19 = sld [smem:[#allocation13_spill]] }
 0x9ee   : > { %p2265_p6 = scmp.ge.s32.totalorder %s3102_s4, 2 }
 0x9ef   : > { %s1853_s26 = sand.u32 1, %s3103_s19  }
 0x9f0   : > { %p2261_p7 = pnand %p2265_p6, %p2687_p11  ;;  %s1854_s13 = scalar_lea.sflag [#allocation6], %s1853_s26 }
 0x9f2   : > { %p2262_p3 = pneg %p2261_p7 }
 0x9f4   : > { %2489 = dma.done.wait (%p2262_p3), %s1854_s13, 128  }
 0x9f5   : > { %2491 = vsyncadd (%p2262_p3), %s1854_s13, 4294967168  ;;  %s33_s20 = sadd.s32 1, %s3102_s4   ;;  %s3105_s29 = sld [smem:[#allocation14_spill]] }
 0x9f6   : > { %p30_p1 = scmp.ge.s32.totalorder %s33_s20, 6   ;;  %s3106_s30 = sld [smem:[#allocation15_spill]] }
 0x9f7   : > { %s3107_s15 = sld [smem:[#allocation24_spill]] }
 0x9f8   : > { %s3108_s16 = sld [smem:[#allocation17_spill]]  ;;  %32 = sbr.rel (!%p30_p1) target bundleno = 19 (0x13), region = 178 }
 0x9f9   : > { %s3109_s17 = sld [smem:[#allocation18_spill]] }
 0x9fa   : > { %s3110_s18 = sld [smem:[#allocation20_spill]] }
 0x9fb   : > { %s3111_s19 = sld [smem:[#allocation21_spill]] }
 0x9fd   :  { %1859 = vsyncpa [#allocation5], 1 }
 0x9fe   :  { %1861 = vsyncpa [#allocation5 + $0x1], 1 }
 0x9ff   :  { %1862 = vsyncpa [#allocation8], 1 }
 0xa00   :  { %1864 = vsyncpa [#allocation8 + $0x1], 1 }
 0xa01   :  { %1865 = vsyncpa [#allocation6], 1 }
 0xa02   :  { %1867 = vsyncpa [#allocation6 + $0x1], 1 }

</bundles_post_ra>
